<compile_context>
chip_gen: v5e
topology: v5e:2x2
jax: 0.10.0
libtpu: 0.0.40
codegen_flags: <defaults>
</compile_context>

<pallas_src>
import functools

import jax
import jax.numpy as jnp
from jax.experimental import pallas as pl
from jax.experimental.pallas import tpu as pltpu

NUM_INTERVAL_CLASSES = 4     # stands in for len(np.unique(y_train_intervals))
NUM_TIME_OUTPUTS = 8
IN_FEATURES = 3
IN_PAD = 8                   # input features padded 3 -> 8 (sublane-friendly K)
HEAD_WIDTH = 128             # fused head output width (lane-dense)
BIAS_LANES = 512             # packed-bias slab width (max hidden width)

# per-layer true output widths of the trunk (fc1..fc6) and fused head
LAYER_WIDTHS = (128, 256, 512, 256, 128, 64, HEAD_WIDTH)


def _mlp_kernel(x_ref,
                w1, w2, w3, w4, w5, w6, wh,
                b_ref,
                out_ref):
    """Whole forward pass for one batch tile; weights stay resident in VMEM."""

    def layer(h, w_ref, bias_row, width, act):
        # bf16 operands -> single-pass MXU matmul, f32 accumulate.
        y = jnp.dot(h.astype(jnp.bfloat16), w_ref[...],
                    preferred_element_type=jnp.float32)
        y = y + b_ref[bias_row:bias_row + 1, :width]   # (1, width) broadcast
        return jnp.tanh(y) if act else y
        # dropout(p=0.3) is identity at inference time

    h = x_ref[...]                          # (TB, 8) f32, zero-padded features
    h = layer(h, w1, 0, 128, True)          # fc1
    h = layer(h, w2, 1, 256, True)          # fc2
    h = layer(h, w3, 2, 512, True)          # fc3
    h = layer(h, w4, 3, 256, True)          # fc4
    h = layer(h, w5, 4, 128, True)          # fc5
    h = layer(h, w6, 5, 64, True)           # fc6
    # fused heads: lanes [0:C) = interval logits, lanes [C:C+8) = delivery time
    out_ref[...] = layer(h, wh, 6, HEAD_WIDTH, False)


def _round_up(n, m):
    return ((n + m - 1) // m) * m


def _const_spec(shape):
    # grid-invariant weight/bias tensors: same full block every grid step
    return pl.BlockSpec(shape, lambda i: (0,) * len(shape))


@functools.partial(jax.jit, static_argnames=("tile_b",))
def interval_and_time_predictor(x, params, *, tile_b=256):
    """x: (B, 3) float32.  Returns (interval_logits (B, C), delivery_time (B, 8))."""
    B = x.shape[0]
    # Effective batch tile: multiple of 8, never larger than the padded batch.
    tb = min(_round_up(tile_b, 8), _round_up(B, 8))
    Bp = _round_up(B, tb)

    # zero-pad features 3 -> 8 and batch B -> Bp (plain-JAX glue)
    x_pad = jnp.zeros((Bp, IN_PAD), jnp.float32).at[:B, :IN_FEATURES].set(x)

    (w1, w2, w3, w4, w5, w6, wh, b_all) = params

    grid = (Bp // tb,)
    in_specs = [pl.BlockSpec((tb, IN_PAD), lambda i: (i, 0))]
    for w in (w1, w2, w3, w4, w5, w6, wh):
        in_specs.append(_const_spec(w.shape))
    in_specs.append(_const_spec(b_all.shape))

    out = pl.pallas_call(
        _mlp_kernel,
        out_shape=jax.ShapeDtypeStruct((Bp, HEAD_WIDTH), jnp.float32),
        grid_spec=pltpu.PrefetchScalarGridSpec(
            num_scalar_prefetch=0,
            grid=grid,
            in_specs=in_specs,
            out_specs=pl.BlockSpec((tb, HEAD_WIDTH), lambda i: (i, 0)),
        ),
        compiler_params=pltpu.CompilerParams(
            dimension_semantics=("parallel",)),
    )(x_pad, w1, w2, w3, w4, w5, w6, wh, b_all)

    interval_logits = out[:B, :NUM_INTERVAL_CLASSES]
    delivery_time = out[:B, NUM_INTERVAL_CLASSES:
                            NUM_INTERVAL_CLASSES + NUM_TIME_OUTPUTS]
    return interval_logits, delivery_time


def init_params(key):
    """Deterministic synthetic parameters in the kernel's packed layout.

    Weights are (in, out) bf16; the seven biases are packed into one
    (8, 512) f32 slab (row i = layer i, zero-padded along lanes).
    """
    keys = jax.random.split(key, 8)

    def linear(k, fan_in, fan_out):
        # PyTorch-like uniform(-1/sqrt(fan_in), 1/sqrt(fan_in)) init.
        bound = 1.0 / (float(fan_in) ** 0.5)
        kw, kb = jax.random.split(k)
        w = jax.random.uniform(kw, (fan_in, fan_out), jnp.float32, -bound, bound)
        b = jax.random.uniform(kb, (fan_out,), jnp.float32, -bound, bound)
        return w, b

    w1t, b1 = linear(keys[0], IN_FEATURES, 128)
    w2, b2 = linear(keys[1], 128, 256)
    w3, b3 = linear(keys[2], 256, 512)
    w4, b4 = linear(keys[3], 512, 256)
    w5, b5 = linear(keys[4], 256, 128)
    w6, b6 = linear(keys[5], 128, 64)
    wi, bi = linear(keys[6], 64, NUM_INTERVAL_CLASSES)
    wt, bt = linear(keys[7], 64, NUM_TIME_OUTPUTS)

    # fc1: pad the input dimension 3 -> 8 with zero rows (padded lanes inert)
    w1 = jnp.zeros((IN_PAD, 128), jnp.float32).at[:IN_FEATURES, :].set(w1t)

    # fuse the two heads into one (64, 128) weight + one bias row
    wh = jnp.zeros((64, HEAD_WIDTH), jnp.float32)
    wh = wh.at[:, :NUM_INTERVAL_CLASSES].set(wi)
    wh = wh.at[:, NUM_INTERVAL_CLASSES:
                  NUM_INTERVAL_CLASSES + NUM_TIME_OUTPUTS].set(wt)
    bh = jnp.zeros((HEAD_WIDTH,), jnp.float32)
    bh = bh.at[:NUM_INTERVAL_CLASSES].set(bi)
    bh = bh.at[NUM_INTERVAL_CLASSES:
               NUM_INTERVAL_CLASSES + NUM_TIME_OUTPUTS].set(bt)

    # pack all biases (f32) into a single slab -> one DMA instead of eight
    b_all = jnp.zeros((8, BIAS_LANES), jnp.float32)
    for row, b in enumerate((b1, b2, b3, b4, b5, b6, bh)):
        b_all = b_all.at[row, :b.shape[0]].set(b)

    bf16 = lambda w: w.astype(jnp.bfloat16)
    return (bf16(w1), bf16(w2), bf16(w3), bf16(w4),
            bf16(w5), bf16(w6), bf16(wh), b_all)


def _reference(x, params):
    """Pure-JAX reference using the same bf16-matmul / f32-accumulate recipe."""
    (w1, w2, w3, w4, w5, w6, wh, b_all) = params
    B = x.shape[0]
    h = jnp.zeros((B, IN_PAD), jnp.float32).at[:, :IN_FEATURES].set(x)
    for row, w in enumerate((w1, w2, w3, w4, w5, w6)):
        width = LAYER_WIDTHS[row]
        y = jnp.dot(h.astype(jnp.bfloat16), w, preferred_element_type=jnp.float32)
        h = jnp.tanh(y + b_all[row, :width])
    y = jnp.dot(h.astype(jnp.bfloat16), wh, preferred_element_type=jnp.float32)
    out = y + b_all[6, :HEAD_WIDTH]
    return (out[:, :NUM_INTERVAL_CLASSES],
            out[:, NUM_INTERVAL_CLASSES:NUM_INTERVAL_CLASSES + NUM_TIME_OUTPUTS])


if __name__ == "__main__":
    key = jax.random.PRNGKey(0)
    k_param, k_x1, k_x2 = jax.random.split(key, 3)
    params = init_params(k_param)

    # small test: whole batch in a single grid step
    B = 16
    x = jax.random.normal(k_x1, (B, IN_FEATURES), jnp.float32)
    interval_logits, delivery_time = interval_and_time_predictor(x, params)
    jax.block_until_ready((interval_logits, delivery_time))

    ref_i, ref_t = _reference(x, params)
    assert interval_logits.shape == (B, NUM_INTERVAL_CLASSES)
    assert delivery_time.shape == (B, NUM_TIME_OUTPUTS)
    assert jnp.allclose(interval_logits, ref_i, atol=1e-3, rtol=1e-3)
    assert jnp.allclose(delivery_time, ref_t, atol=1e-3, rtol=1e-3)

    # second check: non-multiple batch + multi-step grid (exercises padding path)
    B2 = 37
    x2 = jax.random.normal(k_x2, (B2, IN_FEATURES), jnp.float32)
    oi2, ot2 = interval_and_time_predictor(x2, params, tile_b=16)
    jax.block_until_ready((oi2, ot2))
    ref_i2, ref_t2 = _reference(x2, params)
    assert oi2.shape == (B2, NUM_INTERVAL_CLASSES)
    assert ot2.shape == (B2, NUM_TIME_OUTPUTS)
    assert jnp.allclose(oi2, ref_i2, atol=1e-3, rtol=1e-3)
    assert jnp.allclose(ot2, ref_t2, atol=1e-3, rtol=1e-3)

    print("KERNEL_OK")
</pallas_src>

<mosaic_0001>
module attributes {stable_mosaic.version = 11 : i64} {
  func.func @_mlp_kernel(%arg0: i32, %arg1: memref<16x8xf32, #tpu.memory_space<vmem>>, %arg2: memref<8x128xbf16, #tpu.memory_space<vmem>>, %arg3: memref<128x256xbf16, #tpu.memory_space<vmem>>, %arg4: memref<256x512xbf16, #tpu.memory_space<vmem>>, %arg5: memref<512x256xbf16, #tpu.memory_space<vmem>>, %arg6: memref<256x128xbf16, #tpu.memory_space<vmem>>, %arg7: memref<128x64xbf16, #tpu.memory_space<vmem>>, %arg8: memref<64x128xbf16, #tpu.memory_space<vmem>>, %arg9: memref<8x512xf32, #tpu.memory_space<vmem>>, %arg10: memref<16x128xf32, #tpu.memory_space<vmem>>) attributes {dimension_semantics = [#tpu.dimension_semantics<parallel>], iteration_bounds = array<i64: 1>, scalar_prefetch = 0 : i64, scratch_operands = 0 : i64, tpu.core_type = #tpu.core_type<tc>, window_params = [{transform_indices = @transform_0, window_bounds = array<i64: 16, 8>}, {pipeline_mode = #tpu.pipeline_mode<synchronous>, transform_indices = @transform_1, window_bounds = array<i64: 8, 128>}, {pipeline_mode = #tpu.pipeline_mode<synchronous>, transform_indices = @transform_2, window_bounds = array<i64: 128, 256>}, {pipeline_mode = #tpu.pipeline_mode<synchronous>, transform_indices = @transform_3, window_bounds = array<i64: 256, 512>}, {pipeline_mode = #tpu.pipeline_mode<synchronous>, transform_indices = @transform_4, window_bounds = array<i64: 512, 256>}, {pipeline_mode = #tpu.pipeline_mode<synchronous>, transform_indices = @transform_5, window_bounds = array<i64: 256, 128>}, {pipeline_mode = #tpu.pipeline_mode<synchronous>, transform_indices = @transform_6, window_bounds = array<i64: 128, 64>}, {pipeline_mode = #tpu.pipeline_mode<synchronous>, transform_indices = @transform_7, window_bounds = array<i64: 64, 128>}, {pipeline_mode = #tpu.pipeline_mode<synchronous>, transform_indices = @transform_8, window_bounds = array<i64: 8, 512>}, {transform_indices = @transform_9, window_bounds = array<i64: 16, 128>}]} {
    %c0 = arith.constant 0 : index
    %c0_0 = arith.constant 0 : index
    %0 = vector.load %arg1[%c0, %c0_0] : memref<16x8xf32, #tpu.memory_space<vmem>>, vector<16x8xf32>
    %1 = arith.truncf %0 : vector<16x8xf32> to vector<16x8xbf16>
    %c0_1 = arith.constant 0 : index
    %c0_2 = arith.constant 0 : index
    %2 = vector.load %arg2[%c0_1, %c0_2] : memref<8x128xbf16, #tpu.memory_space<vmem>>, vector<8x128xbf16>
    %cst = arith.constant dense<0.000000e+00> : vector<16x128xf32>
    %3 = tpu.matmul %1, %2, %cst {dimension_numbers = #tpu.dot_dimension_numbers<[1], [0], [0], [1], [0, 0, 1, 1], [], []>} : vector<16x8xbf16>, vector<8x128xbf16>, vector<16x128xf32> -> vector<16x128xf32>
    %c0_3 = arith.constant 0 : index
    %c0_4 = arith.constant 0 : index
    %4 = vector.load %arg9[%c0_3, %c0_4] : memref<8x512xf32, #tpu.memory_space<vmem>>, vector<1x128xf32>
    %5 = vector.broadcast %4 : vector<1x128xf32> to vector<16x128xf32>
    %6 = arith.addf %3, %5 : vector<16x128xf32>
    %7 = math.tanh %6 : vector<16x128xf32>
    %8 = arith.truncf %7 : vector<16x128xf32> to vector<16x128xbf16>
    %c0_5 = arith.constant 0 : index
    %c0_6 = arith.constant 0 : index
    %9 = vector.load %arg3[%c0_5, %c0_6] : memref<128x256xbf16, #tpu.memory_space<vmem>>, vector<128x256xbf16>
    %cst_7 = arith.constant dense<0.000000e+00> : vector<16x256xf32>
    %10 = tpu.matmul %8, %9, %cst_7 {dimension_numbers = #tpu.dot_dimension_numbers<[1], [0], [0], [1], [0, 0, 1, 1], [], []>} : vector<16x128xbf16>, vector<128x256xbf16>, vector<16x256xf32> -> vector<16x256xf32>
    %c1 = arith.constant 1 : index
    %c0_8 = arith.constant 0 : index
    %11 = vector.load %arg9[%c1, %c0_8] : memref<8x512xf32, #tpu.memory_space<vmem>>, vector<1x256xf32>
    %12 = vector.broadcast %11 : vector<1x256xf32> to vector<16x256xf32>
    %13 = arith.addf %10, %12 : vector<16x256xf32>
    %14 = math.tanh %13 : vector<16x256xf32>
    %15 = arith.truncf %14 : vector<16x256xf32> to vector<16x256xbf16>
    %c0_9 = arith.constant 0 : index
    %c0_10 = arith.constant 0 : index
    %16 = vector.load %arg4[%c0_9, %c0_10] : memref<256x512xbf16, #tpu.memory_space<vmem>>, vector<256x512xbf16>
    %cst_11 = arith.constant dense<0.000000e+00> : vector<16x512xf32>
    %17 = tpu.matmul %15, %16, %cst_11 {dimension_numbers = #tpu.dot_dimension_numbers<[1], [0], [0], [1], [0, 0, 1, 1], [], []>} : vector<16x256xbf16>, vector<256x512xbf16>, vector<16x512xf32> -> vector<16x512xf32>
    %c2 = arith.constant 2 : index
    %c0_12 = arith.constant 0 : index
    %18 = vector.load %arg9[%c2, %c0_12] : memref<8x512xf32, #tpu.memory_space<vmem>>, vector<1x512xf32>
    %19 = vector.broadcast %18 : vector<1x512xf32> to vector<16x512xf32>
    %20 = arith.addf %17, %19 : vector<16x512xf32>
    %21 = math.tanh %20 : vector<16x512xf32>
    %22 = arith.truncf %21 : vector<16x512xf32> to vector<16x512xbf16>
    %c0_13 = arith.constant 0 : index
    %c0_14 = arith.constant 0 : index
    %23 = vector.load %arg5[%c0_13, %c0_14] : memref<512x256xbf16, #tpu.memory_space<vmem>>, vector<512x256xbf16>
    %cst_15 = arith.constant dense<0.000000e+00> : vector<16x256xf32>
    %24 = tpu.matmul %22, %23, %cst_15 {dimension_numbers = #tpu.dot_dimension_numbers<[1], [0], [0], [1], [0, 0, 1, 1], [], []>} : vector<16x512xbf16>, vector<512x256xbf16>, vector<16x256xf32> -> vector<16x256xf32>
    %c3 = arith.constant 3 : index
    %c0_16 = arith.constant 0 : index
    %25 = vector.load %arg9[%c3, %c0_16] : memref<8x512xf32, #tpu.memory_space<vmem>>, vector<1x256xf32>
    %26 = vector.broadcast %25 : vector<1x256xf32> to vector<16x256xf32>
    %27 = arith.addf %24, %26 : vector<16x256xf32>
    %28 = math.tanh %27 : vector<16x256xf32>
    %29 = arith.truncf %28 : vector<16x256xf32> to vector<16x256xbf16>
    %c0_17 = arith.constant 0 : index
    %c0_18 = arith.constant 0 : index
    %30 = vector.load %arg6[%c0_17, %c0_18] : memref<256x128xbf16, #tpu.memory_space<vmem>>, vector<256x128xbf16>
    %cst_19 = arith.constant dense<0.000000e+00> : vector<16x128xf32>
    %31 = tpu.matmul %29, %30, %cst_19 {dimension_numbers = #tpu.dot_dimension_numbers<[1], [0], [0], [1], [0, 0, 1, 1], [], []>} : vector<16x256xbf16>, vector<256x128xbf16>, vector<16x128xf32> -> vector<16x128xf32>
    %c4 = arith.constant 4 : index
    %c0_20 = arith.constant 0 : index
    %32 = vector.load %arg9[%c4, %c0_20] : memref<8x512xf32, #tpu.memory_space<vmem>>, vector<1x128xf32>
    %33 = vector.broadcast %32 : vector<1x128xf32> to vector<16x128xf32>
    %34 = arith.addf %31, %33 : vector<16x128xf32>
    %35 = math.tanh %34 : vector<16x128xf32>
    %36 = arith.truncf %35 : vector<16x128xf32> to vector<16x128xbf16>
    %c0_21 = arith.constant 0 : index
    %c0_22 = arith.constant 0 : index
    %37 = vector.load %arg7[%c0_21, %c0_22] : memref<128x64xbf16, #tpu.memory_space<vmem>>, vector<128x64xbf16>
    %cst_23 = arith.constant dense<0.000000e+00> : vector<16x64xf32>
    %38 = tpu.matmul %36, %37, %cst_23 {dimension_numbers = #tpu.dot_dimension_numbers<[1], [0], [0], [1], [0, 0, 1, 1], [], []>} : vector<16x128xbf16>, vector<128x64xbf16>, vector<16x64xf32> -> vector<16x64xf32>
    %c5 = arith.constant 5 : index
    %c0_24 = arith.constant 0 : index
    %39 = vector.load %arg9[%c5, %c0_24] : memref<8x512xf32, #tpu.memory_space<vmem>>, vector<1x64xf32>
    %40 = vector.broadcast %39 : vector<1x64xf32> to vector<16x64xf32>
    %41 = arith.addf %38, %40 : vector<16x64xf32>
    %42 = math.tanh %41 : vector<16x64xf32>
    %43 = arith.truncf %42 : vector<16x64xf32> to vector<16x64xbf16>
    %c0_25 = arith.constant 0 : index
    %c0_26 = arith.constant 0 : index
    %44 = vector.load %arg8[%c0_25, %c0_26] : memref<64x128xbf16, #tpu.memory_space<vmem>>, vector<64x128xbf16>
    %cst_27 = arith.constant dense<0.000000e+00> : vector<16x128xf32>
    %45 = tpu.matmul %43, %44, %cst_27 {dimension_numbers = #tpu.dot_dimension_numbers<[1], [0], [0], [1], [0, 0, 1, 1], [], []>} : vector<16x64xbf16>, vector<64x128xbf16>, vector<16x128xf32> -> vector<16x128xf32>
    %c6 = arith.constant 6 : index
    %c0_28 = arith.constant 0 : index
    %46 = vector.load %arg9[%c6, %c0_28] : memref<8x512xf32, #tpu.memory_space<vmem>>, vector<1x128xf32>
    %47 = vector.broadcast %46 : vector<1x128xf32> to vector<16x128xf32>
    %48 = arith.addf %45, %47 : vector<16x128xf32>
    %c0_29 = arith.constant 0 : index
    %c0_30 = arith.constant 0 : index
    %49 = vector.load %arg10[%c0_29, %c0_30] : memref<16x128xf32, #tpu.memory_space<vmem>>, vector<16x128xf32>
    tpu.vector_store %arg10[%c0_29, %c0_30], %48 {strides = array<i32>} : memref<16x128xf32, #tpu.memory_space<vmem>>, vector<16x128xf32>,
    return
  }
  func.func @transform_0(%arg0: i32) -> (i32, i32) {
    %c0_i32 = arith.constant 0 : i32
    %c0_i32_0 = arith.constant 0 : i32
    return %arg0, %c0_i32 : i32, i32
  }
  func.func @transform_1(%arg0: i32) -> (i32, i32) {
    %c0_i32 = arith.constant 0 : i32
    %c0_i32_0 = arith.constant 0 : i32
    %c0_i32_1 = arith.constant 0 : i32
    return %c0_i32, %c0_i32_0 : i32, i32
  }
  func.func @transform_2(%arg0: i32) -> (i32, i32) {
    %c0_i32 = arith.constant 0 : i32
    %c0_i32_0 = arith.constant 0 : i32
    %c0_i32_1 = arith.constant 0 : i32
    return %c0_i32, %c0_i32_0 : i32, i32
  }
  func.func @transform_3(%arg0: i32) -> (i32, i32) {
    %c0_i32 = arith.constant 0 : i32
    %c0_i32_0 = arith.constant 0 : i32
    %c0_i32_1 = arith.constant 0 : i32
    return %c0_i32, %c0_i32_0 : i32, i32
  }
  func.func @transform_4(%arg0: i32) -> (i32, i32) {
    %c0_i32 = arith.constant 0 : i32
    %c0_i32_0 = arith.constant 0 : i32
    %c0_i32_1 = arith.constant 0 : i32
    return %c0_i32, %c0_i32_0 : i32, i32
  }
  func.func @transform_5(%arg0: i32) -> (i32, i32) {
    %c0_i32 = arith.constant 0 : i32
    %c0_i32_0 = arith.constant 0 : i32
    %c0_i32_1 = arith.constant 0 : i32
    return %c0_i32, %c0_i32_0 : i32, i32
  }
  func.func @transform_6(%arg0: i32) -> (i32, i32) {
    %c0_i32 = arith.constant 0 : i32
    %c0_i32_0 = arith.constant 0 : i32
    %c0_i32_1 = arith.constant 0 : i32
    return %c0_i32, %c0_i32_0 : i32, i32
  }
  func.func @transform_7(%arg0: i32) -> (i32, i32) {
    %c0_i32 = arith.constant 0 : i32
    %c0_i32_0 = arith.constant 0 : i32
    %c0_i32_1 = arith.constant 0 : i32
    return %c0_i32, %c0_i32_0 : i32, i32
  }
  func.func @transform_8(%arg0: i32) -> (i32, i32) {
    %c0_i32 = arith.constant 0 : i32
    %c0_i32_0 = arith.constant 0 : i32
    %c0_i32_1 = arith.constant 0 : i32
    return %c0_i32, %c0_i32_0 : i32, i32
  }
  func.func @transform_9(%arg0: i32) -> (i32, i32) {
    %c0_i32 = arith.constant 0 : i32
    %c0_i32_0 = arith.constant 0 : i32
    return %arg0, %c0_i32 : i32, i32
  }
}

</mosaic_0001>

<bundles_post_ra>
// kernel: interval_and_time_predictor.1
= control target key start
LH: loop header
LB: loop body
LE: loop exit
PB: predicated region body
PF: predicated region fallthrough
CT: control target
= control target key end

     0   :  { %14 = vsyncpa [#allocation3], 0  ;;  %s2869_s0 = inlined_call_operand.vmem [shape: f32[16,8], index: 0, kind: input, shape index: {}]   ;;  %s2870_s1 = inlined_call_operand.vmem [shape: bf16[8,128], index: 1, kind: input, shape index: {}]   ;;  %s2871_s2 = inlined_call_operand.vmem [shape: bf16[128,256], index: 2, kind: input, shape index: {}]   ;;  %s2872_s3 = inlined_call_operand.hbm [shape: bf16[256,512], index: 3, kind: input, shape index: {}]   ;;  %s2873_s4 = inlined_call_operand.hbm [shape: bf16[512,256], index: 4, kind: input, shape index: {}]   ;;  %s2874_s5 = inlined_call_operand.hbm [shape: bf16[256,128], index: 5, kind: input, shape index: {}]   ;;  %s2875_s6 = inlined_call_operand.vmem [shape: bf16[128,64], index: 6, kind: input, shape index: {}]   ;;  %s2876_s7 = inlined_call_operand.hbm [shape: bf16[64,128], index: 7, kind: input, shape index: {}]   ;;  %s2877_s8 = inlined_call_operand.hbm [shape: f32[8,512], index: 8, kind: input, shape index: {}]   ;;  %s2878_s9 = inlined_call_operand.vmem [shape: f32[16,128], index: 9, kind: output, shape index: {}]  }
   0x1   :  { %15 = vsyncpa [#allocation5], 0  ;;  %s40_s11 = sshll.u32 %s2873_s4, 4  ;;  %s41_s11 = int_to_ptr.hbm [resolvable:$true] %s40_s11 }
   0x2   :  { %16 = vsyncpa [#allocation8], 0  ;;  %s2649_s12 = smov [#allocation4]   ;;  %s2650_s14 = smov 128  }
   0x3   :  { %s42_s13 = sshll.u32 %s2649_s12, 4  ;;  %s2651_s15 = smov 8   ;;  %s43_s13 = int_to_ptr.vmem [resolvable:$true] %s42_s13 }
   0x4   :  { %48 = dma.hbm_to_vmem [thread:$0]  %s41_s11, 8192, %s43_s13, [#allocation5], %s2650_s14, %s2650_s14, %s2651_s15  }
   0x5   :  { %s68_s18 = sshll.u32 %s2876_s7, 4  ;;  %s2652_s19 = smov [#allocation7]   ;;  %s69_s18 = int_to_ptr.hbm [resolvable:$true] %s68_s18 }
   0x6   :  { %s70_s20 = sshll.u32 %s2652_s19, 4  ;;  %s27_s23 = sshll.u32 %s2872_s3, 4  ;;  %s71_s20 = int_to_ptr.vmem [resolvable:$true] %s70_s20  ;;  %s28_s23 = int_to_ptr.hbm [resolvable:$true] %s27_s23 }
   0x7   :  { %s2653_s4 = smov 64   ;;  %s2654_s24 = smov 4  }
   0x8   :  { %76 = dma.hbm_to_vmem [thread:$0]  %s69_s18, 512, %s71_s20, [#allocation8], %s2653_s4, %s2653_s4, %s2654_s24  }
   0x9   :  { %s2655_s25 = smov [#allocation2]   ;;  %s53_s29 = sshll.u32 %s2874_s5, 4  ;;  %s54_s29 = int_to_ptr.hbm [resolvable:$true] %s53_s29 }
   0xa   :  { %s29_s26 = sshll.u32 %s2655_s25, 4  ;;  %s2656_s7 = smov 256   ;;  %s30_s26 = int_to_ptr.vmem [resolvable:$true] %s29_s26 }
   0xb   :  { %s2657_s30 = smov 16   ;;  %s2658_s10 = smov [#allocation6]  }
   0xc   :  { %35 = dma.hbm_to_vmem [thread:$0]  %s28_s23, 8192, %s30_s26, [#allocation3], %s2656_s7, %s2656_s7, %s2657_s30  }
   0xd   :  { %s55_s11 = sshll.u32 %s2658_s10, 4  ;;  %s82_s13 = sshll.u32 %s2877_s8, 4  ;;  %s56_s11 = int_to_ptr.vmem [resolvable:$true] %s55_s11  ;;  %s83_s13 = int_to_ptr.hbm [resolvable:$true] %s82_s13 }
   0xe   :  { %61 = dma.hbm_to_vmem [thread:$0]  %s54_s29, 2048, %s56_s11, [#allocation5], %s2653_s4, %s2653_s4, %s2654_s24  }
   0xf   :  { %s2659_s14 = smov [#allocation9]  }
  0x10   :  { %s84_s15 = sshll.u32 %s2659_s14, 4  ;;  %s85_s15 = int_to_ptr.vmem [resolvable:$true] %s84_s15 }
  0x11   :  { %87 = dma.hbm_to_vmem [thread:$0]  %s83_s13, 512, %s85_s15, [#allocation8]  }
  0x12   :  { %2643 = dma.done.wait [#allocation3], 8192  }
  0x13   :  { %2644 = vsyncadd [#allocation3], 4294959104 }
  0x14   :  { %2645 = dma.done.wait [#allocation5], 10240  }
  0x15   :  { %2646 = vsyncadd [#allocation5], 4294957056 }
  0x16   :  { %2647 = dma.done.wait [#allocation8], 1024  }
  0x17   :  { %2648 = vsyncadd [#allocation8], 4294966272  ;;  %vm118_vm0 = vcmask 1043456   ;;  %v112_v0 = vld [vmem:[%s2870_s1] sm:$0xf]  ;;  %v110_v2 = vld [vmem:[%s2869_s0 + $0x8] sm:$0xff] }
  0x18   :  { %v109_v1 = vld [vmem:[%s2869_s0] sm:$0xff]  ;;  %v120_v3 = vsel %vm118_vm0, %v112_v0, 0  ;;  %vm114_vm1 = vcmask 64512   ;;  %v1665_v5 = vld [vmem:[%s2871_s2 + $0x70] sm:$0xf]  ;;  %vm1579_vm2 = vcmask 523264  }
  0x19   :  { %v111_v4 = vpack.c.bf16 %v110_v2, %v109_v1  ;;  %v2311_v6 = vld [vmem:[%s2871_s2 + $0x74] sm:$0xf0]  ;;  %129 = vmatpush.bf16.msra.mxu0 %v120_v3  ;;  %v2310_v8 = vld [vmem:[%s2871_s2 + $0x74] sm:$0xf]  ;;  %v1667_v9 = vld [vmem:[%s2871_s2 + $0x78] sm:$0xf0] }
  0x1a   :  { %v1666_v7 = vor.u32 %v2311_v6, %v1665_v5  ;;  %v1657_v10 = vld [vmem:[%s2871_s2 + $0x60] sm:$0xf]  ;;  %v1670_v11 = vor.u32 %v2310_v8, %v1667_v9  ;;  %v2309_v12 = vld [vmem:[%s2871_s2 + $0x64] sm:$0xf0]  ;;  %v2308_v13 = vld [vmem:[%s2871_s2 + $0x64] sm:$0xf] }
  0x1b   :  { %v1659_v14 = vld [vmem:[%s2871_s2 + $0x68] sm:$0xf0]  ;;  %v1658_v15 = vor.u32 %v2309_v12, %v1657_v10  ;;  %v1649_v17 = vld [vmem:[%s2871_s2 + $0x50] sm:$0xf]  ;;  %v2307_v18 = vld [vmem:[%s2871_s2 + $0x54] sm:$0xf0] }
  0x1c   :  { %242 = vmatpush.bf16.msra.mxu1 %v1666_v7  ;;  %1606 = vmatmul.msk.bf16.vlgmr.msra.gmra.mxu0 %vm114_vm1, %v111_v4  ;;  %v1662_v16 = vor.u32 %v2308_v13, %v1659_v14  ;;  %v2306_v19 = vld [vmem:[%s2871_s2 + $0x54] sm:$0xf]  ;;  %v1651_v20 = vld [vmem:[%s2871_s2 + $0x58] sm:$0xf0]  ;;  %v1650_v21 = vor.u32 %v2307_v18, %v1649_v17  ;;  %v1641_v23 = vld [vmem:[%s2871_s2 + $0x40] sm:$0xf] }
  0x1d   :  { %256 = vmatpush.bf16.msra.mxu2 %v1670_v11  ;;  %v1654_v22 = vor.u32 %v2306_v19, %v1651_v20  ;;  %v2305_v24 = vld [vmem:[%s2871_s2 + $0x44] sm:$0xf0]  ;;  %v2304_v25 = vld [vmem:[%s2871_s2 + $0x44] sm:$0xf]  ;;  %v1643_v27 = vld [vmem:[%s2871_s2 + $0x48] sm:$0xf0] }
  0x1e   :  { %v1642_v26 = vor.u32 %v2305_v24, %v1641_v23  ;;  %v1646_v28 = vor.u32 %v2304_v25, %v1643_v27  ;;  %v1633_v29 = vld [vmem:[%s2871_s2 + $0x30] sm:$0xf]  ;;  %v2303_v30 = vld [vmem:[%s2871_s2 + $0x34] sm:$0xf0]  ;;  %v2302_v31 = vld [vmem:[%s2871_s2 + $0x34] sm:$0xf] }
  0x1f   :  { %v1634_v32 = vor.u32 %v2303_v30, %v1633_v29  ;;  %v1635_v33 = vld [vmem:[%s2871_s2 + $0x38] sm:$0xf0]  ;;  %v1625_v35 = vld [vmem:[%s2871_s2 + $0x20] sm:$0xf]  ;;  %v2301_v36 = vld [vmem:[%s2871_s2 + $0x24] sm:$0xf0] }
  0x20   :  { %243 = vmatpush.bf16.msra.mxu1 %v1658_v15  ;;  %v1638_v34 = vor.u32 %v2302_v31, %v1635_v33  ;;  %v2300_v37 = vld [vmem:[%s2871_s2 + $0x24] sm:$0xf]  ;;  %v1626_v38 = vor.u32 %v2301_v36, %v1625_v35  ;;  %v1627_v39 = vld [vmem:[%s2871_s2 + $0x28] sm:$0xf0]  ;;  %v1617_v41 = vld [vmem:[%s2871_s2 + $0x10] sm:$0xf] }
  0x21   :  { %257 = vmatpush.bf16.msra.mxu2 %v1662_v16  ;;  %v1630_v40 = vor.u32 %v2300_v37, %v1627_v39  ;;  %v2299_v42 = vld [vmem:[%s2871_s2 + $0x14] sm:$0xf0]  ;;  %v2298_v43 = vld [vmem:[%s2871_s2 + $0x14] sm:$0xf]  ;;  %v1619_v45 = vld [vmem:[%s2871_s2 + $0x18] sm:$0xf0] }
  0x22   :  { %v1618_v44 = vor.u32 %v2299_v42, %v1617_v41  ;;  %v1609_v46 = vld [vmem:[%s2871_s2] sm:$0xf]  ;;  %v2297_v47 = vld [vmem:[%s2871_s2 + $0x4] sm:$0xf0]  ;;  %v1622_v48 = vor.u32 %v2298_v43, %v1619_v45  ;;  %v2296_v49 = vld [vmem:[%s2871_s2 + $0x4] sm:$0xf] }
  0x23   :  { %v1611_v50 = vld [vmem:[%s2871_s2 + $0x8] sm:$0xf0]  ;;  %v1610_v51 = vor.u32 %v2297_v47, %v1609_v46  ;;  %v1785_v53 = vld [vmem:[#allocation2 + $0xe0] sm:$0xf]  ;;  %v2342_v54 = vld [vmem:[#allocation2 + $0xec] sm:$0xf0] }
  0x24   :  { %244 = vmatpush.bf16.msra.mxu1 %v1650_v21  ;;  %v1614_v52 = vor.u32 %v2296_v49, %v1611_v50  ;;  %v2340_v55 = vld [vmem:[#allocation2 + $0xe4] sm:$0xf]  ;;  %v1786_v56 = vor.u32 %v2342_v54, %v1785_v53  ;;  %v1787_v57 = vld [vmem:[#allocation2 + $0xf0] sm:$0xf0]  ;;  %v1769_v58 = vld [vmem:[#allocation2 + $0xc0] sm:$0xf] }
  0x25   :  { %258 = vmatpush.bf16.msra.mxu2 %v1654_v22  ;;  %v2338_v59 = vld [vmem:[#allocation2 + $0xcc] sm:$0xf0]  ;;  %v1790_v60 = vor.u32 %v2340_v55, %v1787_v57  ;;  %v2336_v61 = vld [vmem:[#allocation2 + $0xc4] sm:$0xf]  ;;  %v1771_v62 = vld [vmem:[#allocation2 + $0xd0] sm:$0xf0] }
  0x26   :  { %v1913_v63 = vld [vmem:[#allocation2 + $0x1e0] sm:$0xf]  ;;  %671 = vmatpush.bf16.msra.mxu3 %v1786_v56  ;;  %v1770_v0 = vor.u32 %v2338_v59, %v1769_v58  ;;  %v2374_v1 = vld [vmem:[#allocation2 + $0x1ec] sm:$0xf0]  ;;  %v2372_v2 = vld [vmem:[#allocation2 + $0x1e4] sm:$0xf]  ;;  %v1774_v4 = vor.u32 %v2336_v61, %v1771_v62 }
  0x27   :  { %v1915_v3 = vld [vmem:[#allocation2 + $0x1f0] sm:$0xf0]  ;;  %v1914_v5 = vor.u32 %v2374_v1, %v1913_v63  ;;  %v1753_v7 = vld [vmem:[#allocation2 + $0xa0] sm:$0xf]  ;;  %v2334_v8 = vld [vmem:[#allocation2 + $0xac] sm:$0xf0] }
  0x28   :  { %245 = vmatpush.bf16.msra.mxu1 %v1642_v26  ;;  %v1918_v6 = vor.u32 %v2372_v2, %v1915_v3  ;;  %v2332_v9 = vld [vmem:[#allocation2 + $0xa4] sm:$0xf]  ;;  %v1755_v10 = vld [vmem:[#allocation2 + $0xb0] sm:$0xf0]  ;;  %v1897_v11 = vld [vmem:[#allocation2 + $0x1c0] sm:$0xf]  ;;  %v1754_v16 = vor.u32 %v2334_v8, %v1753_v7 }
  0x29   :  { %259 = vmatpush.bf16.msra.mxu2 %v1646_v28  ;;  %v2370_v12 = vld [vmem:[#allocation2 + $0x1cc] sm:$0xf0]  ;;  %685 = vmatpush.bf16.msrb.mxu0 %v1914_v5  ;;  %v2368_v14 = vld [vmem:[#allocation2 + $0x1c4] sm:$0xf]  ;;  %v1899_v15 = vld [vmem:[#allocation2 + $0x1d0] sm:$0xf0]  ;;  %v1758_v20 = vor.u32 %v2332_v9, %v1755_v10 }
  0x2a   :  { %v1898_v13 = vor.u32 %v2370_v12, %v1897_v11  ;;  %672 = vmatpush.bf16.msra.mxu3 %v1770_v0  ;;  %v1902_v17 = vor.u32 %v2368_v14, %v1899_v15  ;;  %v1737_v18 = vld [vmem:[#allocation2 + $0x80] sm:$0xf]  ;;  %v2330_v19 = vld [vmem:[#allocation2 + $0x8c] sm:$0xf0]  ;;  %v2364_v23 = vld [vmem:[#allocation2 + $0x1a4] sm:$0xf] }
  0x2b   :  { %v1881_v21 = vld [vmem:[#allocation2 + $0x1a0] sm:$0xf]  ;;  %v2366_v22 = vld [vmem:[#allocation2 + $0x1ac] sm:$0xf0]  ;;  %v2328_v24 = vld [vmem:[#allocation2 + $0x84] sm:$0xf]  ;;  %v1738_v30 = vor.u32 %v2330_v19, %v1737_v18 }
  0x2c   :  { %246 = vmatpush.bf16.msra.mxu1 %v1634_v32  ;;  %v1739_v25 = vld [vmem:[#allocation2 + $0x90] sm:$0xf0]  ;;  %v1882_v27 = vor.u32 %v2366_v22, %v1881_v21  ;;  %v1865_v29 = vld [vmem:[#allocation2 + $0x180] sm:$0xf]  ;;  %v2362_v31 = vld [vmem:[#allocation2 + $0x18c] sm:$0xf0] }
  0x2d   :  { %260 = vmatpush.bf16.msra.mxu2 %v1638_v34  ;;  %v1883_v26 = vld [vmem:[#allocation2 + $0x1b0] sm:$0xf0]  ;;  %686 = vmatpush.bf16.msrb.mxu0 %v1898_v13  ;;  %v2360_v32 = vld [vmem:[#allocation2 + $0x184] sm:$0xf]  ;;  %v1742_v35 = vor.u32 %v2328_v24, %v1739_v25  ;;  %v1721_v36 = vld [vmem:[#allocation2 + $0x60] sm:$0xf]  ;;  %v1866_v41 = vor.u32 %v2362_v31, %v1865_v29 }
  0x2e   :  { %v1886_v28 = vor.u32 %v2364_v23, %v1883_v26  ;;  %673 = vmatpush.bf16.msra.mxu3 %v1754_v16  ;;  %v1867_v33 = vld [vmem:[#allocation2 + $0x190] sm:$0xf0]  ;;  %v2326_v37 = vld [vmem:[#allocation2 + $0x6c] sm:$0xf0]  ;;  %v1849_v43 = vld [vmem:[#allocation2 + $0x160] sm:$0xf] }
  0x2f   :  { %v1723_v39 = vld [vmem:[#allocation2 + $0x70] sm:$0xf0]  ;;  %v1870_v42 = vor.u32 %v2360_v32, %v1867_v33  ;;  %v2358_v45 = vld [vmem:[#allocation2 + $0x16c] sm:$0xf0]  ;;  %v2356_v46 = vld [vmem:[#allocation2 + $0x164] sm:$0xf] }
  0x30   :  { %247 = vmatpush.bf16.msra.mxu1 %v1626_v38  ;;  %v2324_v38 = vld [vmem:[#allocation2 + $0x64] sm:$0xf]  ;;  %v1851_v47 = vld [vmem:[#allocation2 + $0x170] sm:$0xf0]  ;;  %v1705_v49 = vld [vmem:[#allocation2 + $0x40] sm:$0xf]  ;;  %v1850_v54 = vor.u32 %v2358_v45, %v1849_v43 }
  0x31   :  { %261 = vmatpush.bf16.msra.mxu2 %v1630_v40  ;;  %v113_v40 = vld [vmem:[#allocation9] ss:$0 sm:$0xff]  ;;  %687 = vmatpush.bf16.msrb.mxu0 %v1882_v27  ;;  %v2322_v50 = vld [vmem:[#allocation2 + $0x4c] sm:$0xf0]  ;;  %v1854_v55 = vor.u32 %v2356_v46, %v1851_v47  ;;  %v2316_v1 = vld [vmem:[#allocation2 + $0x24] sm:$0xf] }
  0x32   :  { %674 = vmatpush.bf16.msra.mxu3 %v1738_v30  ;;  %v1706_v56 = vor.u32 %v2322_v50, %v1705_v49  ;;  %v1689_v63 = vld [vmem:[#allocation2 + $0x20] sm:$0xf]  ;;  %v2318_v0 = vld [vmem:[#allocation2 + $0x2c] sm:$0xf0]  ;;  %v1691_v3 = vld [vmem:[#allocation2 + $0x30] sm:$0xf0] }
  0x33   :  { %v1690_v2 = vor.u32 %v2318_v0, %v1689_v63  ;;  %v1833_v5 = vld [vmem:[#allocation2 + $0x140] sm:$0xf]  ;;  %v2352_v7 = vld [vmem:[#allocation2 + $0x144] sm:$0xf]  ;;  %v1835_v9 = vld [vmem:[#allocation2 + $0x150] sm:$0xf0] }
  0x34   :  { %248 = vmatpush.bf16.msra.mxu1 %v1618_v44  ;;  %v1722_v44 = vor.u32 %v2326_v37, %v1721_v36  ;;  %v1838_v10 = vor.u32 %v2352_v7, %v1835_v9  ;;  %v1673_v11 = vld [vmem:[#allocation2] sm:$0xf]  ;;  %v2314_v12 = vld [vmem:[#allocation2 + $0xc] sm:$0xf0]  ;;  %v2312_v13 = vld [vmem:[#allocation2 + $0x4] sm:$0xf] }
  0x35   :  { %262 = vmatpush.bf16.msra.mxu2 %v1622_v48  ;;  %v1726_v48 = vor.u32 %v2324_v38, %v1723_v39  ;;  %688 = vmatpush.bf16.msrb.mxu0 %v1866_v41  ;;  %v1674_v14 = vor.u32 %v2314_v12, %v1673_v11  ;;  %v1675_v15 = vld [vmem:[#allocation2 + $0x10] sm:$0xf0]  ;;  %v1793_v16 = vld [vmem:[#allocation2 + $0xe8] sm:$0xf]  ;;  %v1795_v21 = vld [vmem:[#allocation2 + $0xf8] sm:$0xf0] }
  0x36   :  { %675 = vmatpush.bf16.msra.mxu3 %v1722_v44  ;;  %v1678_v18 = vor.u32 %v2312_v13, %v1675_v15  ;;  %v1817_v23 = vld [vmem:[#allocation2 + $0x120] sm:$0xf]  ;;  %v2350_v24 = vld [vmem:[#allocation2 + $0x12c] sm:$0xf0]  ;;  %v2348_v25 = vld [vmem:[#allocation2 + $0x124] sm:$0xf] }
  0x37   :  { %v1818_v26 = vor.u32 %v2350_v24, %v1817_v23  ;;  %v1819_v27 = vld [vmem:[#allocation2 + $0x130] sm:$0xf0]  ;;  %v1777_v29 = vld [vmem:[#allocation2 + $0xc8] sm:$0xf]  ;;  %v2339_v30 = vld [vmem:[#allocation2 + $0xd4] sm:$0xf0] }
  0x38   :  { %249 = vmatpush.bf16.msra.mxu1 %v1610_v51  ;;  %v2320_v51 = vld [vmem:[#allocation2 + $0x44] sm:$0xf]  ;;  %v2337_v31 = vld [vmem:[#allocation2 + $0xcc] sm:$0xf]  ;;  %v1778_v32 = vor.u32 %v2339_v30, %v1777_v29  ;;  %v1779_v33 = vld [vmem:[#allocation2 + $0xd8] sm:$0xf0] }
  0x39   :  { %263 = vmatpush.bf16.msra.mxu2 %v1614_v52  ;;  %v1707_v52 = vld [vmem:[#allocation2 + $0x50] sm:$0xf0]  ;;  %689 = vmatpush.bf16.msrb.mxu0 %v1850_v54  ;;  %v1782_v36 = vor.u32 %v2337_v31, %v1779_v33  ;;  %v2344_v38 = vld [vmem:[#allocation2 + $0x104] sm:$0xf]  ;;  %v2373_v43 = vld [vmem:[#allocation2 + $0x1ec] sm:$0xf] }
  0x3a   :  { %v1710_v58 = vor.u32 %v2320_v51, %v1707_v52  ;;  %676 = vmatpush.bf16.msra.mxu3 %v1706_v56  ;;  %v1803_v39 = vld [vmem:[#allocation2 + $0x110] sm:$0xf0]  ;;  %v1923_v44 = vld [vmem:[#allocation2 + $0x1f8] sm:$0xf0]  ;;  %v1761_v47 = vld [vmem:[#allocation2 + $0xa8] sm:$0xf] }
  0x3b   :  { %v1806_v41 = vor.u32 %v2344_v38, %v1803_v39  ;;  %v1926_v46 = vor.u32 %v2373_v43, %v1923_v44  ;;  %v2333_v49 = vld [vmem:[#allocation2 + $0xac] sm:$0xf]  ;;  %v1763_v51 = vld [vmem:[#allocation2 + $0xb8] sm:$0xf0]  ;;  %v2371_v54 = vld [vmem:[#allocation2 + $0x1d4] sm:$0xf0] }
  0x3c   :  { %699 = vmatpush.bf16.msrb.mxu1 %v1790_v60  ;;  %v1766_v52 = vor.u32 %v2333_v49, %v1763_v51  ;;  %v1747_v63 = vld [vmem:[#allocation2 + $0x98] sm:$0xf0]  ;;  %v1729_v7 = vld [vmem:[#allocation2 + $0x68] sm:$0xf]  ;;  %v2325_v9 = vld [vmem:[#allocation2 + $0x6c] sm:$0xf] }
  0x3d   :  { %713 = vmatpush.bf16.msrb.mxu2 %v1918_v6  ;;  %v2354_v6 = vld [vmem:[#allocation2 + $0x14c] sm:$0xf0]  ;;  %v1731_v11 = vld [vmem:[#allocation2 + $0x78] sm:$0xf0]  ;;  %v1873_v13 = vld [vmem:[#allocation2 + $0x188] sm:$0xf] }
  0x3e   :  { %677 = vmatpush.bf16.msra.mxu3 %v1690_v2  ;;  %v1834_v8 = vor.u32 %v2354_v6, %v1833_v5  ;;  %v2367_v2 = vld [vmem:[#allocation2 + $0x1b4] sm:$0xf0]  ;;  %v1891_v5 = vld [vmem:[#allocation2 + $0x1b8] sm:$0xf0]  ;;  %v1734_v12 = vor.u32 %v2325_v9, %v1731_v11  ;;  %v2361_v15 = vld [vmem:[#allocation2 + $0x18c] sm:$0xf] }
  0x3f   :  { %v1715_v23 = vld [vmem:[#allocation2 + $0x58] sm:$0xf0]  ;;  %v1697_v31 = vld [vmem:[#allocation2 + $0x28] sm:$0xf]  ;;  %v2317_v33 = vld [vmem:[#allocation2 + $0x2c] sm:$0xf] }
  0x40   :  { %700 = vmatpush.bf16.msrb.mxu1 %v1774_v4  ;;  %v1694_v4 = vor.u32 %v2316_v1, %v1691_v3  ;;  %690 = vmatpush.bf16.msrb.mxu0 %v1834_v8  ;;  %v1889_v1 = vld [vmem:[#allocation2 + $0x1a8] sm:$0xf]  ;;  %v2365_v3 = vld [vmem:[#allocation2 + $0x1ac] sm:$0xf]  ;;  %v2327_v8 = vld [vmem:[#allocation2 + $0x74] sm:$0xf0] }
  0x41   :  { %714 = vmatpush.bf16.msrb.mxu2 %v1902_v17  ;;  %v2343_v17 = vld [vmem:[#allocation2 + $0xf4] sm:$0xf0]  ;;  %v1894_v6 = vor.u32 %v2365_v3, %v1891_v5  ;;  %v1859_v29 = vld [vmem:[#allocation2 + $0x178] sm:$0xf0]  ;;  %v1825_v49 = vld [vmem:[#allocation2 + $0x128] sm:$0xf] }
  0x42   :  { %v1794_v19 = vor.u32 %v2343_v17, %v1793_v16  ;;  %678 = vmatpush.bf16.msra.mxu3 %v1674_v14  ;;  %v2363_v14 = vld [vmem:[#allocation2 + $0x194] sm:$0xf0]  ;;  %v1875_v17 = vld [vmem:[#allocation2 + $0x198] sm:$0xf0]  ;;  %v2349_v51 = vld [vmem:[#allocation2 + $0x12c] sm:$0xf] }
  0x43   :  { %v1874_v16 = vor.u32 %v2363_v14, %v1873_v13  ;;  %v2315_v44 = vld [vmem:[#allocation2 + $0x14] sm:$0xf0]  ;;  %v1977_v14 = vld [vmem:[#allocation4 + $0x60] sm:$0xf] }
  0x44   :  { %701 = vmatpush.bf16.msrb.mxu1 %v1758_v20  ;;  %v2341_v20 = vld [vmem:[#allocation2 + $0xec] sm:$0xf]  ;;  %691 = vmatpush.bf16.msrb.mxu0 %v1818_v26  ;;  %v2359_v26 = vld [vmem:[#allocation2 + $0x174] sm:$0xf0] }
  0x45   :  { %715 = vmatpush.bf16.msrb.mxu2 %v1886_v28  ;;  %v1798_v22 = vor.u32 %v2341_v20, %v1795_v21  ;;  %v1822_v28 = vor.u32 %v2348_v25, %v1819_v27  ;;  %v1878_v20 = vor.u32 %v2361_v15, %v1875_v17  ;;  %v1857_v25 = vld [vmem:[#allocation2 + $0x168] sm:$0xf]  ;;  %v2357_v27 = vld [vmem:[#allocation2 + $0x16c] sm:$0xf]  ;;  %v2407_v17 = vld [vmem:[#allocation4 + $0xf4] sm:$0xf0] }
  0x46   :  { %727 = vmatpush.bf16.msrb.mxu3 %v1794_v19  ;;  %v2323_v19 = vld [vmem:[#allocation2 + $0x54] sm:$0xf0]  ;;  %v1862_v30 = vor.u32 %v2357_v27, %v1859_v29  ;;  %v2389_v15 = vld [vmem:[#allocation4 + $0x64] sm:$0xf0] }
  0x47   :  { %v2385_v29 = vld [vmem:[#allocation4 + $0x44] sm:$0xf0] }
  0x48   :  { %702 = vmatpush.bf16.msrb.mxu1 %v1742_v35  ;;  %v2346_v35 = vld [vmem:[#allocation2 + $0x10c] sm:$0xf0] }
  0x49   :  { %716 = vmatpush.bf16.msrb.mxu2 %v1870_v42  ;;  %v2375_v42 = vld [vmem:[#allocation2 + $0x1f4] sm:$0xf0] }
  0x4a   :  { %728 = vmatpush.bf16.msrb.mxu3 %v1778_v32  ;;  %v2319_v32 = vld [vmem:[#allocation2 + $0x34] sm:$0xf0] }
  0x4c   :  { %703 = vmatpush.bf16.msrb.mxu1 %v1726_v48  ;;  %v2335_v48 = vld [vmem:[#allocation2 + $0xb4] sm:$0xf0] }
  0x4d   :  { %717 = vmatpush.bf16.msrb.mxu2 %v1854_v55  ;;  %v1762_v50 = vor.u32 %v2335_v48, %v1761_v47  ;;  %v2369_v55 = vld [vmem:[#allocation2 + $0x1cc] sm:$0xf] }
  0x4f   :  { %729 = vmatpush.bf16.msrb.mxu3 %v1762_v50  ;;  %v2351_v50 = vld [vmem:[#allocation2 + $0x134] sm:$0xf0] }
  0x50   :  { %704 = vmatpush.bf16.msrb.mxu1 %v1710_v58 }
  0x51   :  { %718 = vmatpush.bf16.msrb.mxu2 %v1838_v10  ;;  %v1730_v10 = vor.u32 %v2327_v8, %v1729_v7  ;;  %v1985_v7 = vld [vmem:[#allocation4 + $0x70] sm:$0xf]  ;;  %v2391_v8 = vld [vmem:[#allocation4 + $0x74] sm:$0xf0] }
  0x54   :  { %705 = vmatpush.bf16.msrb.mxu1 %v1694_v4  ;;  %v1890_v4 = vor.u32 %v2367_v2, %v1889_v1 }
  0x55   :  { %719 = vmatpush.bf16.msrb.mxu2 %v1822_v28  ;;  %v1858_v28 = vor.u32 %v2359_v26, %v1857_v25  ;;  %v2041_v25 = vld [vmem:[#allocation4 + $0xe0] sm:$0xf]  ;;  %v2405_v26 = vld [vmem:[#allocation4 + $0xe4] sm:$0xf0] }
  0x58   :  { %706 = vmatpush.bf16.msrb.mxu1 %v1678_v18  ;;  %v1713_v18 = vld [vmem:[#allocation2 + $0x48] sm:$0xf] }
  0x59   :  { %720 = vmatpush.bf16.msrb.mxu2 %v1806_v41  ;;  %v1714_v21 = vor.u32 %v2323_v19, %v1713_v18  ;;  %v1843_v41 = vld [vmem:[#allocation2 + $0x158] sm:$0xf0]  ;;  %v1978_v18 = vor.u32 %v2389_v15, %v1977_v14  ;;  %v2435_v14 = vld [vmem:[#allocation4 + $0x1d4] sm:$0xf0]  ;;  %v2390_v15 = vld [vmem:[#allocation4 + $0x74] sm:$0xf] }
  0x99   :  { %v131_v34 = vpop.f32.mrf.mxu0 }
  0x9a   :  { %v132_v53 = vadd.f32 %v131_v34, %v113_v40  ;;  %v1801_v34 = vld [vmem:[#allocation2 + $0x100] sm:$0xf] }
  0x9b   :  { %v1802_v37 = vor.u32 %v2346_v35, %v1801_v34  ;;  %v1698_v34 = vor.u32 %v2319_v32, %v1697_v31  ;;  %v1699_v35 = vld [vmem:[#allocation2 + $0x38] sm:$0xf0]  ;;  %v2033_v31 = vld [vmem:[#allocation4 + $0xd0] sm:$0xf]  ;;  %v2403_v32 = vld [vmem:[#allocation4 + $0xd4] sm:$0xf0] }
  0x9c   :  { %2479 = vtanh.f32 %v132_v53  ;;  %v1905_v53 = vld [vmem:[#allocation2 + $0x1c8] sm:$0xf]  ;;  %v1702_v38 = vor.u32 %v2317_v33, %v1699_v35  ;;  %v1953_v35 = vld [vmem:[#allocation4 + $0x30] sm:$0xf] }
  0x9d   :  { %692 = vmatpush.bf16.msrb.mxu0 %v1802_v37  ;;  %v1906_v56 = vor.u32 %v2371_v54, %v1905_v53  ;;  %v2355_v37 = vld [vmem:[#allocation2 + $0x154] sm:$0xf0]  ;;  %v1827_v53 = vld [vmem:[#allocation2 + $0x138] sm:$0xf0] }
  0xa1   :  { %v133_v57 = vpop.f32.mrf.mxu0 }
  0xa2   :  { %v134_v59 = vadd.f32 %v133_v57, %v113_v40  ;;  %v2480_v60 = vpop.eup %2479  ;;  %v1921_v40 = vld [vmem:[#allocation2 + $0x1e8] sm:$0xf]  ;;  %v1907_v57 = vld [vmem:[#allocation2 + $0x1d8] sm:$0xf0] }
  0xa3   :  { %v1922_v45 = vor.u32 %v2375_v42, %v1921_v40  ;;  %v1910_v58 = vor.u32 %v2369_v55, %v1907_v57  ;;  %v2353_v40 = vld [vmem:[#allocation2 + $0x14c] sm:$0xf]  ;;  %v1681_v42 = vld [vmem:[#allocation2 + $0x8] sm:$0xf]  ;;  %v1826_v55 = vor.u32 %v2351_v50, %v1825_v49  ;;  %v2105_v49 = vld [vmem:[#allocation4 + $0x160] sm:$0xf] }
  0xa4   :  { %2481 = vtanh.f32 %v134_v59  ;;  %v1745_v59 = vld [vmem:[#allocation2 + $0x88] sm:$0xf]  ;;  %v1846_v43 = vor.u32 %v2353_v40, %v1843_v41  ;;  %v1682_v47 = vor.u32 %v2315_v44, %v1681_v42  ;;  %v2113_v40 = vld [vmem:[#allocation4 + $0x170] sm:$0xf]  ;;  %v2423_v41 = vld [vmem:[#allocation4 + $0x174] sm:$0xf0] }
  0xa5   :  { %741 = vmatpush.bf16.msra.mxu0 %v1922_v45  ;;  %v2313_v45 = vld [vmem:[#allocation2 + $0xc] sm:$0xf]  ;;  %v1945_v44 = vld [vmem:[#allocation4 + $0x20] sm:$0xf]  ;;  %v2421_v50 = vld [vmem:[#allocation4 + $0x164] sm:$0xf0] }
  0xa9   :  { %742 = vmatpush.bf16.msra.mxu0 %v1906_v56  ;;  %v1830_v56 = vor.u32 %v2349_v51, %v1827_v53  ;;  %v2177_v53 = vld [vmem:[#allocation4 + $0x1f0] sm:$0xf] }
  0xaa   :  { %v2482_v61 = vpop.eup %2481 }
  0xab   :  { %v138_v62 = vpack.c.bf16 %v2482_v61, %v2480_v60  ;;  %v2331_v60 = vld [vmem:[#allocation2 + $0x94] sm:$0xf0]  ;;  %v2329_v61 = vld [vmem:[#allocation2 + $0x8c] sm:$0xf] }
  0xac   :  { %v1750_v0 = vor.u32 %v2329_v61, %v1747_v63 }
  0xad   :  { %250 = vmatmul.bf16.vlgmr.msra.gmra.mxu1 %v138_v62  ;;  %264 = vmatmul.bf16.vlgmr.msra.gmra.mxu2 %v138_v62  ;;  %v1746_v62 = vor.u32 %v2331_v60, %v1745_v59  ;;  %v2347_v59 = vld [vmem:[#allocation2 + $0x114] sm:$0xf0]  ;;  %v2345_v60 = vld [vmem:[#allocation2 + $0x10c] sm:$0xf] }
  0xae   :  { %755 = vmatpush.bf16.msra.mxu1 %v1798_v22  ;;  %769 = vmatpush.bf16.msra.mxu2 %v1926_v46  ;;  %v2321_v22 = vld [vmem:[#allocation2 + $0x4c] sm:$0xf]  ;;  %v1683_v46 = vld [vmem:[#allocation2 + $0x18] sm:$0xf0] }
  0xaf   :  { %730 = vmatpush.bf16.msrb.mxu3 %v1746_v62  ;;  %743 = vmatpush.bf16.msra.mxu0 %v1890_v4  ;;  %v1718_v24 = vor.u32 %v2321_v22, %v1715_v23  ;;  %v1686_v48 = vor.u32 %v2313_v45, %v1683_v46  ;;  %v1811_v62 = vld [vmem:[#allocation2 + $0x118] sm:$0xf0]  ;;  %v2381_v45 = vld [vmem:[#allocation4 + $0x24] sm:$0xf0]  ;;  %v2017_v46 = vld [vmem:[#allocation4 + $0xb0] sm:$0xf] }
  0xb0   :  { %v1814_v1 = vor.u32 %v2345_v60, %v1811_v62  ;;  %v2397_v60 = vld [vmem:[#allocation4 + $0xa4] sm:$0xf0]  ;;  %v2419_v62 = vld [vmem:[#allocation4 + $0x154] sm:$0xf0] }
  0xb2   :  { %756 = vmatpush.bf16.msra.mxu1 %v1782_v36  ;;  %770 = vmatpush.bf16.msra.mxu2 %v1910_v58  ;;  %v1841_v36 = vld [vmem:[#allocation2 + $0x148] sm:$0xf] }
  0xb3   :  { %731 = vmatpush.bf16.msrb.mxu3 %v1730_v10  ;;  %744 = vmatpush.bf16.msra.mxu0 %v1874_v16  ;;  %v1842_v39 = vor.u32 %v2355_v37, %v1841_v36  ;;  %v1809_v58 = vld [vmem:[#allocation2 + $0x108] sm:$0xf]  ;;  %v2049_v16 = vld [vmem:[#allocation4 + $0xf0] sm:$0xf]  ;;  %v2383_v36 = vld [vmem:[#allocation4 + $0x34] sm:$0xf0] }
  0xb4   :  { %v1810_v61 = vor.u32 %v2347_v59, %v1809_v58  ;;  %v2050_v23 = vor.u32 %v2407_v17, %v2049_v16  ;;  %v2025_v37 = vld [vmem:[#allocation4 + $0xc0] sm:$0xf]  ;;  %v1987_v17 = vld [vmem:[#allocation4 + $0x78] sm:$0xf0] }
  0xb5   :  { %v2009_v58 = vld [vmem:[#allocation4 + $0xa0] sm:$0xf] }
  0xb6   :  { %757 = vmatpush.bf16.msra.mxu1 %v1766_v52  ;;  %771 = vmatpush.bf16.msra.mxu2 %v1894_v6  ;;  %v156_v52 = vld [vmem:[#allocation9 + $0x1] ss:$8 sm:$0x3] }
  0xb7   :  { %732 = vmatpush.bf16.msrb.mxu3 %v1714_v21  ;;  %745 = vmatpush.bf16.msra.mxu0 %v1858_v28  ;;  %v158_v57 = vperm.slane %v156_v52, 0  ;;  %v159_v2 = vperm.slane %v156_v52, 1  ;;  %v2387_v21 = vld [vmem:[#allocation4 + $0x54] sm:$0xf0]  ;;  %v1961_v28 = vld [vmem:[#allocation4 + $0x40] sm:$0xf]  ;;  %v2106_v52 = vor.u32 %v2421_v50, %v2105_v49 }
  0xb8   :  { %v1962_v33 = vor.u32 %v2385_v29, %v1961_v28  ;;  %v2388_v28 = vld [vmem:[#allocation4 + $0x64] sm:$0xf]  ;;  %v1979_v29 = vld [vmem:[#allocation4 + $0x68] sm:$0xf0]  ;;  %v2137_v49 = vld [vmem:[#allocation4 + $0x1a0] sm:$0xf] }
  0xb9   :  { %v2429_v50 = vld [vmem:[#allocation4 + $0x1a4] sm:$0xf0] }
  0xba   :  { %758 = vmatpush.bf16.msra.mxu1 %v1750_v0  ;;  %772 = vmatpush.bf16.msra.mxu2 %v1878_v20  ;;  %v1969_v20 = vld [vmem:[#allocation4 + $0x50] sm:$0xf] }
  0xbb   :  { %733 = vmatpush.bf16.msrb.mxu3 %v1698_v34  ;;  %746 = vmatpush.bf16.msra.mxu0 %v1842_v39  ;;  %v1970_v27 = vor.u32 %v2387_v21, %v1969_v20  ;;  %v2034_v34 = vor.u32 %v2403_v32, %v2033_v31  ;;  %v2401_v39 = vld [vmem:[#allocation4 + $0xc4] sm:$0xf0]  ;;  %v2081_v21 = vld [vmem:[#allocation4 + $0x130] sm:$0xf]  ;;  %v2406_v31 = vld [vmem:[#allocation4 + $0xf4] sm:$0xf] }
  0xbc   :  { %v2026_v42 = vor.u32 %v2401_v39, %v2025_v37  ;;  %v2393_v20 = vld [vmem:[#allocation4 + $0x84] sm:$0xf0]  ;;  %v2051_v32 = vld [vmem:[#allocation4 + $0xf8] sm:$0xf0]  ;;  %v2386_v39 = vld [vmem:[#allocation4 + $0x54] sm:$0xf] }
  0xbe   :  { %759 = vmatpush.bf16.msra.mxu1 %v1734_v12  ;;  %773 = vmatpush.bf16.msra.mxu2 %v1862_v30  ;;  %v1986_v12 = vor.u32 %v2391_v8, %v1985_v7  ;;  %v2042_v30 = vor.u32 %v2405_v26, %v2041_v25  ;;  %v2395_v8 = vld [vmem:[#allocation4 + $0x94] sm:$0xf0]  ;;  %v2433_v25 = vld [vmem:[#allocation4 + $0x1c4] sm:$0xf0] }
  0xbf   :  { %734 = vmatpush.bf16.msrb.mxu3 %v1682_v47  ;;  %747 = vmatpush.bf16.msra.mxu0 %v1826_v55  ;;  %v1946_v47 = vor.u32 %v2381_v45, %v1945_v44  ;;  %v2043_v44 = vld [vmem:[#allocation4 + $0xe8] sm:$0xf0] }
  0xc2   :  { %760 = vmatpush.bf16.msra.mxu1 %v1718_v24  ;;  %774 = vmatpush.bf16.msra.mxu2 %v1846_v43  ;;  %v2114_v43 = vor.u32 %v2423_v41, %v2113_v40  ;;  %v1971_v40 = vld [vmem:[#allocation4 + $0x58] sm:$0xf0] }
  0xc3   :  { %748 = vmatpush.bf16.msra.mxu0 %v1810_v61  ;;  %v2097_v61 = vld [vmem:[#allocation4 + $0x150] sm:$0xf] }
  0xc6   :  { %761 = vmatpush.bf16.msra.mxu1 %v1702_v38  ;;  %775 = vmatpush.bf16.msra.mxu2 %v1830_v56  ;;  %v1954_v38 = vor.u32 %v2383_v36, %v1953_v35  ;;  %v1937_v56 = vld [vmem:[#allocation4 + $0x10] sm:$0xf]  ;;  %v2413_v35 = vld [vmem:[#allocation4 + $0x124] sm:$0xf0] }
  0xc7   :  { %v2145_v36 = vld [vmem:[#allocation4 + $0x1b0] sm:$0xf] }
  0xca   :  { %762 = vmatpush.bf16.msra.mxu1 %v1686_v48  ;;  %776 = vmatpush.bf16.msra.mxu2 %v1814_v1  ;;  %v2399_v48 = vld [vmem:[#allocation4 + $0xb4] sm:$0xf0]  ;;  %v2169_v1 = vld [vmem:[#allocation4 + $0x1e0] sm:$0xf] }
  0xcb   :  { %v2018_v51 = vor.u32 %v2399_v48, %v2017_v46  ;;  %v2065_v46 = vld [vmem:[#allocation4 + $0x110] sm:$0xf] }
 0x12a   :  { %v251_v54 = vpop.f32.mrf.mxu1 }
 0x12b   :  { %v252_v63 = vadd.f32 %v251_v54, %v158_v57  ;;  %v2439_v54 = vld [vmem:[#allocation4 + $0x1f4] sm:$0xf0] }
 0x12c   :  { %v2178_v55 = vor.u32 %v2439_v54, %v2177_v53  ;;  %v1963_v53 = vld [vmem:[#allocation4 + $0x48] sm:$0xf0]  ;;  %v2402_v54 = vld [vmem:[#allocation4 + $0xd4] sm:$0xf] }
 0x12d   :  { %2483 = vtanh.f32 %v252_v63  ;;  %v2010_v63 = vor.u32 %v2397_v60, %v2009_v58  ;;  %v2057_v58 = vld [vmem:[#allocation4 + $0x100] sm:$0xf]  ;;  %v2129_v60 = vld [vmem:[#allocation4 + $0x190] sm:$0xf] }
 0x130   :  { %v265_v0 = vpop.f32.mrf.mxu2 }
 0x131   :  { %v266_v5 = vadd.f32 %v265_v0, %v159_v2  ;;  %v2098_v0 = vor.u32 %v2419_v62, %v2097_v61  ;;  %v2427_v62 = vld [vmem:[#allocation4 + $0x194] sm:$0xf0] }
 0x132   :  { %v253_v3 = vpop.f32.mrf.mxu1 }
 0x133   :  { %v254_v4 = vadd.f32 %v253_v3, %v158_v57  ;;  %v2484_v10 = vpop.eup %2483  ;;  %v2379_v57 = vld [vmem:[#allocation4 + $0x14] sm:$0xf0] }
 0x134   :  { %v1938_v59 = vor.u32 %v2379_v57, %v1937_v56 }
 0x135   :  { %2485 = vtanh.f32 %v254_v4  ;;  %v1929_v4 = vld [vmem:[#allocation4] sm:$0xf] }
 0x136   :  { %2487 = vtanh.f32 %v266_v5  ;;  %v2377_v5 = vld [vmem:[#allocation4 + $0x4] sm:$0xf0] }
 0x137   :  { %v1930_v7 = vor.u32 %v2377_v5, %v1929_v4  ;;  %v2027_v4 = vld [vmem:[#allocation4 + $0xc8] sm:$0xf0]  ;;  %v2422_v5 = vld [vmem:[#allocation4 + $0x174] sm:$0xf] }
 0x138   :  { %v267_v6 = vpop.f32.mrf.mxu2 }
 0x139   :  { %v268_v9 = vadd.f32 %v267_v6, %v159_v2  ;;  %v2437_v2 = vld [vmem:[#allocation4 + $0x1e4] sm:$0xf0]  ;;  %v2001_v6 = vld [vmem:[#allocation4 + $0x90] sm:$0xf] }
 0x13a   :  { %v2170_v3 = vor.u32 %v2437_v2, %v2169_v1  ;;  %v2130_v1 = vor.u32 %v2427_v62, %v2129_v60  ;;  %v2432_v60 = vld [vmem:[#allocation4 + $0x1c4] sm:$0xf] }
 0x13b   :  { %v2486_v11 = vpop.eup %2485  ;;  %2489 = vtanh.f32 %v268_v9  ;;  %v2089_v9 = vld [vmem:[#allocation4 + $0x140] sm:$0xf] }
 0x13c   :  { %v274_v13 = vpack.c.bf16 %v2486_v11, %v2484_v10  ;;  %v2488_v19 = vpop.eup %2487  ;;  %v2417_v10 = vld [vmem:[#allocation4 + $0x144] sm:$0xf0]  ;;  %v2002_v11 = vor.u32 %v2395_v8, %v2001_v6 }
 0x13e   :  { %679 = vmatmul.bf16.vlgmr.msra.gmra.mxu3 %v274_v13  ;;  %707 = vmatmul.bf16.vlgmr.msrb.gmra.mxu1 %v274_v13 }
 0x13f   :  { %1186 = vmatpush.bf16.msra.mxu3 %v1986_v12  ;;  %1214 = vmatpush.bf16.msrb.mxu1 %v2114_v43  ;;  %v2090_v12 = vor.u32 %v2417_v10, %v2089_v9  ;;  %v2404_v43 = vld [vmem:[#allocation4 + $0xe4] sm:$0xf]  ;;  %v2121_v9 = vld [vmem:[#allocation4 + $0x180] sm:$0xf]  ;;  %v2425_v10 = vld [vmem:[#allocation4 + $0x184] sm:$0xf0] }
 0x140   :  { %v2046_v45 = vor.u32 %v2404_v43, %v2043_v44  ;;  %v2394_v43 = vld [vmem:[#allocation4 + $0x94] sm:$0xf] }
 0x141   :  { %v2490_v22 = vpop.eup %2489 }
 0x142   :  { %v275_v24 = vpack.c.bf16 %v2490_v22, %v2488_v19  ;;  %v1993_v19 = vld [vmem:[#allocation4 + $0x80] sm:$0xf] }
 0x143   :  { %1187 = vmatpush.bf16.msra.mxu3 %v1978_v18  ;;  %1215 = vmatpush.bf16.msrb.mxu1 %v2106_v52  ;;  %v1990_v18 = vor.u32 %v2390_v15, %v1987_v17  ;;  %v1994_v22 = vor.u32 %v2393_v20, %v1993_v19  ;;  %v2138_v52 = vor.u32 %v2429_v50, %v2137_v49  ;;  %v2420_v17 = vld [vmem:[#allocation4 + $0x164] sm:$0xf]  ;;  %v2434_v50 = vld [vmem:[#allocation4 + $0x1d4] sm:$0xf] }
 0x144   :  { %693 = vmatmul.bf16.vlgmr.msrb.gmra.mxu0 %v275_v24  ;;  %721 = vmatmul.bf16.vlgmr.msrb.gmra.mxu2 %v275_v24 }
 0x145   :  { %1200 = vmatpush.bf16.msrb.mxu0 %v2050_v23  ;;  %1228 = vmatpush.bf16.msrb.mxu2 %v2178_v55  ;;  %v2415_v23 = vld [vmem:[#allocation4 + $0x134] sm:$0xf0]  ;;  %v2035_v55 = vld [vmem:[#allocation4 + $0xd8] sm:$0xf0] }
 0x146   :  { %v2082_v26 = vor.u32 %v2415_v23, %v2081_v21  ;;  %v2038_v57 = vor.u32 %v2402_v54, %v2035_v55  ;;  %v2438_v21 = vld [vmem:[#allocation4 + $0x1f4] sm:$0xf]  ;;  %v2392_v54 = vld [vmem:[#allocation4 + $0x84] sm:$0xf]  ;;  %v1995_v55 = vld [vmem:[#allocation4 + $0x88] sm:$0xf0] }
 0x147   :  { %1188 = vmatpush.bf16.msra.mxu3 %v1970_v27  ;;  %1216 = vmatpush.bf16.msrb.mxu1 %v2098_v0  ;;  %v1955_v0 = vld [vmem:[#allocation4 + $0x38] sm:$0xf0] }
 0x149   :  { %1201 = vmatpush.bf16.msrb.mxu0 %v2042_v30  ;;  %1229 = vmatpush.bf16.msrb.mxu2 %v2170_v3  ;;  %v1982_v30 = vor.u32 %v2388_v28, %v1979_v29  ;;  %v2400_v3 = vld [vmem:[#allocation4 + $0xc4] sm:$0xf] }
 0x14a   :  { %v2030_v6 = vor.u32 %v2400_v3, %v2027_v4  ;;  %v2396_v28 = vld [vmem:[#allocation4 + $0xa4] sm:$0xf] }
 0x14b   :  { %1189 = vmatpush.bf16.msra.mxu3 %v1962_v33  ;;  %1217 = vmatpush.bf16.msrb.mxu1 %v2090_v12  ;;  %v2054_v33 = vor.u32 %v2406_v31, %v2051_v32  ;;  %v2380_v12 = vld [vmem:[#allocation4 + $0x24] sm:$0xf]  ;;  %v2418_v31 = vld [vmem:[#allocation4 + $0x154] sm:$0xf]  ;;  %v2099_v32 = vld [vmem:[#allocation4 + $0x158] sm:$0xf0] }
 0x14d   :  { %1202 = vmatpush.bf16.msrb.mxu0 %v2034_v34  ;;  %v2073_v34 = vld [vmem:[#allocation4 + $0x120] sm:$0xf] }
 0x14e   :  { %735 = vmatmul.bf16.vlgmr.msrb.gmra.mxu3 %v274_v13  ;;  %763 = vmatmul.bf16.vlgmr.msra.gmra.mxu1 %v274_v13  ;;  %v2161_v13 = vld [vmem:[#allocation4 + $0x1d0] sm:$0xf]  ;;  %v2074_v37 = vor.u32 %v2413_v35, %v2073_v34  ;;  %v2102_v34 = vor.u32 %v2418_v31, %v2099_v32  ;;  %v2436_v35 = vld [vmem:[#allocation4 + $0x1e4] sm:$0xf]  ;;  %v2426_v31 = vld [vmem:[#allocation4 + $0x194] sm:$0xf] }
 0x14f   :  { %1190 = vmatpush.bf16.msra.mxu3 %v1954_v38  ;;  %v2162_v16 = vor.u32 %v2435_v14, %v2161_v13  ;;  %1218 = vmatpush.bf16.msrb.mxu1 %v2082_v26  ;;  %v2431_v38 = vld [vmem:[#allocation4 + $0x1b4] sm:$0xf0]  ;;  %v1947_v13 = vld [vmem:[#allocation4 + $0x28] sm:$0xf0]  ;;  %v2398_v14 = vld [vmem:[#allocation4 + $0xb4] sm:$0xf] }
 0x150   :  { %v2146_v41 = vor.u32 %v2431_v38, %v2145_v36  ;;  %v1950_v15 = vor.u32 %v2380_v12, %v1947_v13  ;;  %v2378_v26 = vld [vmem:[#allocation4 + $0x14] sm:$0xf]  ;;  %v2171_v36 = vld [vmem:[#allocation4 + $0x1e8] sm:$0xf0]  ;;  %v2131_v32 = vld [vmem:[#allocation4 + $0x198] sm:$0xf0] }
 0x151   :  { %1203 = vmatpush.bf16.msrb.mxu0 %v2026_v42  ;;  %1230 = vmatpush.bf16.msrb.mxu2 %v2162_v16  ;;  %v1974_v42 = vor.u32 %v2386_v39, %v1971_v40  ;;  %v2019_v16 = vld [vmem:[#allocation4 + $0xb8] sm:$0xf0]  ;;  %v2174_v38 = vor.u32 %v2436_v35, %v2171_v36  ;;  %v2410_v13 = vld [vmem:[#allocation4 + $0x114] sm:$0xf]  ;;  %v2134_v36 = vor.u32 %v2426_v31, %v2131_v32 }
 0x152   :  { %v2022_v19 = vor.u32 %v2398_v14, %v2019_v16  ;;  %v2428_v16 = vld [vmem:[#allocation4 + $0x1a4] sm:$0xf] }
 0x153   :  { %1191 = vmatpush.bf16.msra.mxu3 %v1946_v47  ;;  %1219 = vmatpush.bf16.msrb.mxu1 %v2074_v37  ;;  %v2411_v47 = vld [vmem:[#allocation4 + $0x114] sm:$0xf0] }
 0x154   :  { %749 = vmatmul.bf16.vlgmr.msra.gmra.mxu0 %v275_v24  ;;  %777 = vmatmul.bf16.vlgmr.msra.gmra.mxu2 %v275_v24  ;;  %v2153_v24 = vld [vmem:[#allocation4 + $0x1c0] sm:$0xf]  ;;  %v2066_v48 = vor.u32 %v2411_v47, %v2065_v46  ;;  %v2416_v46 = vld [vmem:[#allocation4 + $0x144] sm:$0xf]  ;;  %v2091_v47 = vld [vmem:[#allocation4 + $0x148] sm:$0xf0] }
 0x155   :  { %1204 = vmatpush.bf16.msrb.mxu0 %v2018_v51  ;;  %v2154_v27 = vor.u32 %v2433_v25, %v2153_v24  ;;  %v2384_v51 = vld [vmem:[#allocation4 + $0x44] sm:$0xf]  ;;  %v2832_v25 = vld [vmem:[#allocation9 + $0x2] ss:$8 sm:$0xf]  ;;  %v2094_v49 = vor.u32 %v2416_v46, %v2091_v47 }
 0x156   :  { %v1966_v56 = vor.u32 %v2384_v51, %v1963_v53  ;;  %v343_v37 = vperm.slane %v2832_v25, 0  ;;  %v2163_v51 = vld [vmem:[#allocation4 + $0x1d8] sm:$0xf0]  ;;  %v344_v62 = vperm.slane %v2832_v25, 1 }
 0x157   :  { %1192 = vmatpush.bf16.msra.mxu3 %v1938_v59  ;;  %1231 = vmatpush.bf16.msrb.mxu2 %v2154_v27  ;;  %v2409_v59 = vld [vmem:[#allocation4 + $0x104] sm:$0xf0]  ;;  %v1939_v27 = vld [vmem:[#allocation4 + $0x18] sm:$0xf0] }
 0x158   :  { %1220 = vmatpush.bf16.msrb.mxu1 %v2066_v48  ;;  %v2058_v61 = vor.u32 %v2409_v59, %v2057_v58  ;;  %v1942_v29 = vor.u32 %v2378_v26, %v1939_v27  ;;  %v1998_v58 = vor.u32 %v2392_v54, %v1995_v55  ;;  %v2083_v59 = vld [vmem:[#allocation4 + $0x138] sm:$0xf0]  ;;  %v2408_v26 = vld [vmem:[#allocation4 + $0x104] sm:$0xf]  ;;  %v2059_v27 = vld [vmem:[#allocation4 + $0x108] sm:$0xf0] }
 0x159   :  { %1205 = vmatpush.bf16.msrb.mxu0 %v2010_v63  ;;  %v2382_v63 = vld [vmem:[#allocation4 + $0x34] sm:$0xf] }
 0x15a   :  { %v1958_v2 = vor.u32 %v2382_v63, %v1955_v0 }
 0x15b   :  { %1193 = vmatpush.bf16.msra.mxu3 %v1930_v7  ;;  %1232 = vmatpush.bf16.msrb.mxu2 %v2146_v41  ;;  %v2115_v7 = vld [vmem:[#allocation4 + $0x178] sm:$0xf0]  ;;  %v2376_v41 = vld [vmem:[#allocation4 + $0x4] sm:$0xf] }
 0x15c   :  { %1221 = vmatpush.bf16.msrb.mxu1 %v2058_v61  ;;  %v2118_v8 = vor.u32 %v2422_v5, %v2115_v7  ;;  %v2155_v61 = vld [vmem:[#allocation4 + $0x1c8] sm:$0xf0]  ;;  %v2412_v5 = vld [vmem:[#allocation4 + $0x124] sm:$0xf]  ;;  %v2430_v7 = vld [vmem:[#allocation4 + $0x1b4] sm:$0xf] }
 0x15d   :  { %1206 = vmatpush.bf16.msrb.mxu0 %v2002_v11  ;;  %v2122_v11 = vor.u32 %v2425_v10, %v2121_v9  ;;  %v2147_v9 = vld [vmem:[#allocation4 + $0x1b8] sm:$0xf0] }
 0x15e   :  { %v2150_v12 = vor.u32 %v2430_v7, %v2147_v9  ;;  %v2441_v7 = vld [vmem:[#allocation6 + $0x8] sm:$0xff]  ;;  %v2440_v9 = vld [vmem:[#allocation6] sm:$0xff] }
 0x15f   :  { %1242 = vmatpush.bf16.msrb.mxu3 %v1990_v18  ;;  %1233 = vmatpush.bf16.msrb.mxu2 %v2138_v52  ;;  %v2107_v18 = vld [vmem:[#allocation4 + $0x168] sm:$0xf0]  ;;  %v2166_v52 = vor.u32 %v2434_v50, %v2163_v51 }
 0x160   :  { %1270 = vmatpush.bf16.msra.mxu1 %v2118_v8  ;;  %v2110_v20 = vor.u32 %v2420_v17, %v2107_v18  ;;  %v2139_v17 = vld [vmem:[#allocation4 + $0x1a8] sm:$0xf0] }
 0x161   :  { %1207 = vmatpush.bf16.msrb.mxu0 %v1994_v22  ;;  %v2179_v22 = vld [vmem:[#allocation4 + $0x1f8] sm:$0xf0] }
 0x162   :  { %v2182_v24 = vor.u32 %v2438_v21, %v2179_v22  ;;  %v2142_v22 = vor.u32 %v2428_v16, %v2139_v17  ;;  %v2450_v16 = vld [vmem:[#allocation6 + $0x50] sm:$0xff] }
 0x163   :  { %1243 = vmatpush.bf16.msrb.mxu3 %v1982_v30  ;;  %1234 = vmatpush.bf16.msrb.mxu2 %v2130_v1  ;;  %v2011_v30 = vld [vmem:[#allocation4 + $0xa8] sm:$0xf0]  ;;  %v2158_v1 = vor.u32 %v2432_v60, %v2155_v61 }
 0x164   :  { %1271 = vmatpush.bf16.msra.mxu1 %v2110_v20 }
 0x165   :  { %1256 = vmatpush.bf16.msra.mxu0 %v2054_v33  ;;  %v2014_v33 = vor.u32 %v2396_v28, %v2011_v30  ;;  %v345_v28 = vperm.slane %v2832_v25, 2 }
 0x167   :  { %1244 = vmatpush.bf16.msrb.mxu3 %v1974_v42  ;;  %1235 = vmatpush.bf16.msrb.mxu2 %v2122_v11  ;;  %v1931_v42 = vld [vmem:[#allocation4 + $0x8] sm:$0xf0] }
 0x168   :  { %v1934_v44 = vor.u32 %v2376_v41, %v1931_v42  ;;  %1272 = vmatpush.bf16.msra.mxu1 %v2102_v34  ;;  %v2062_v34 = vor.u32 %v2408_v26, %v2059_v27  ;;  %v346_v42 = vperm.slane %v2832_v25, 3 }
 0x169   :  { %1257 = vmatpush.bf16.msra.mxu0 %v2046_v45  ;;  %v2003_v45 = vld [vmem:[#allocation4 + $0x98] sm:$0xf0] }
 0x16a   :  { %v2006_v48 = vor.u32 %v2394_v43, %v2003_v45 }
 0x16b   :  { %1245 = vmatpush.bf16.msrb.mxu3 %v1966_v56  ;;  %1284 = vmatpush.bf16.msra.mxu2 %v2182_v24  ;;  %v2414_v56 = vld [vmem:[#allocation4 + $0x134] sm:$0xf] }
 0x16c   :  { %1273 = vmatpush.bf16.msra.mxu1 %v2094_v49  ;;  %v2086_v0 = vor.u32 %v2414_v56, %v2083_v59 }
 0x16d   :  { %1258 = vmatpush.bf16.msra.mxu0 %v2038_v57 }
 0x16f   :  { %1246 = vmatpush.bf16.msrb.mxu3 %v1958_v2  ;;  %1285 = vmatpush.bf16.msra.mxu2 %v2174_v38 }
 0x170   :  { %1274 = vmatpush.bf16.msra.mxu1 %v2086_v0  ;;  %v2446_v0 = vld [vmem:[#allocation6 + $0x30] sm:$0xff] }
 0x171   :  { %1259 = vmatpush.bf16.msra.mxu0 %v2030_v6  ;;  %v2075_v6 = vld [vmem:[#allocation4 + $0x128] sm:$0xf0] }
 0x172   :  { %v2078_v11 = vor.u32 %v2412_v5, %v2075_v6  ;;  %v2442_v5 = vld [vmem:[#allocation6 + $0x10] sm:$0xff] }
 0x173   :  { %1247 = vmatpush.bf16.msrb.mxu3 %v1950_v15  ;;  %1286 = vmatpush.bf16.msra.mxu2 %v2166_v52  ;;  %v2067_v15 = vld [vmem:[#allocation4 + $0x118] sm:$0xf0]  ;;  %v2454_v6 = vld [vmem:[#allocation6 + $0x70] sm:$0xff] }
 0x174   :  { %1275 = vmatpush.bf16.msra.mxu1 %v2078_v11  ;;  %v2070_v21 = vor.u32 %v2410_v13, %v2067_v15  ;;  %v860_v15 = vld [vmem:[#allocation9 + $0x3] ss:$8 sm:$0x3] }
 0x175   :  { %1260 = vmatpush.bf16.msra.mxu0 %v2022_v19  ;;  %v862_v17 = vperm.slane %v860_v15, 0 }
 0x177   :  { %1248 = vmatpush.bf16.msrb.mxu3 %v1942_v29  ;;  %1287 = vmatpush.bf16.msra.mxu2 %v2158_v1  ;;  %v2445_v1 = vld [vmem:[#allocation6 + $0x28] sm:$0xff] }
 0x178   :  { %1276 = vmatpush.bf16.msra.mxu1 %v2070_v21 }
 0x179   :  { %1261 = vmatpush.bf16.msra.mxu0 %v2014_v33 }
 0x17b   :  { %1249 = vmatpush.bf16.msrb.mxu3 %v1934_v44  ;;  %1288 = vmatpush.bf16.msra.mxu2 %v2150_v12  ;;  %v2451_v12 = vld [vmem:[#allocation6 + $0x58] sm:$0xff] }
 0x17c   :  { %1277 = vmatpush.bf16.msra.mxu1 %v2062_v34 }
 0x17d   :  { %1262 = vmatpush.bf16.msra.mxu0 %v2006_v48 }
 0x17f   :  { %1289 = vmatpush.bf16.msra.mxu2 %v2142_v22 }
 0x181   :  { %1263 = vmatpush.bf16.msra.mxu0 %v1998_v58 }
 0x183   :  { %1290 = vmatpush.bf16.msra.mxu2 %v2134_v36 }
 0x1bb   :  { %v2830_v23 = vpop.f32.mrf.mxu1 }
 0x1bc   :  { %v709_v10 = vadd.f32 %v2830_v23, %v344_v62 }
 0x1c1   :  { %v680_v39 = vpop.f32.mrf.mxu3  ;;  %v694_v40 = vpop.f32.mrf.mxu0 }
 0x1c2   :  { %v681_v53 = vadd.f32 %v680_v39, %v343_v37  ;;  %v2424_v39 = vld [vmem:[#allocation4 + $0x184] sm:$0xf] }
 0x1c3   :  { %v710_v57 = vpop.f32.mrf.mxu1 }
 0x1c4   :  { %v695_v2 = vadd.f32 %v694_v40, %v681_v53  ;;  %v711_v19 = vadd.f32 %v710_v57, %v344_v62  ;;  %v2123_v40 = vld [vmem:[#allocation4 + $0x188] sm:$0xf0] }
 0x1c5   :  { %v2126_v45 = vor.u32 %v2424_v39, %v2123_v40 }
 0x1c6   :  { %2491 = vtanh.f32 %v695_v2  ;;  %v2444_v2 = vld [vmem:[#allocation6 + $0x20] sm:$0xff] }
 0x1c7   :  { %v722_v63 = vpop.f32.mrf.mxu2  ;;  %1291 = vmatpush.bf16.msra.mxu2 %v2126_v45 }
 0x1c8   :  { %v723_v18 = vadd.f32 %v722_v63, %v709_v10  ;;  %v2447_v63 = vld [vmem:[#allocation6 + $0x38] sm:$0xff]  ;;  %v2452_v10 = vld [vmem:[#allocation6 + $0x60] sm:$0xff] }
 0x1c9   :  { %v682_v3 = vpop.f32.mrf.mxu3  ;;  %v696_v4 = vpop.f32.mrf.mxu0 }
 0x1ca   :  { %v683_v8 = vadd.f32 %v682_v3, %v343_v37  ;;  %v2443_v3 = vld [vmem:[#allocation6 + $0x18] sm:$0xff] }
 0x1cb   :  { %v764_v24 = vpop.f32.mrf.mxu1 }
 0x1cc   :  { %v697_v14 = vadd.f32 %v696_v4, %v683_v8  ;;  %v2492_v33 = vpop.eup %2491  ;;  %v765_v50 = vadd.f32 %v764_v24, %v346_v42  ;;  %v2455_v4 = vld [vmem:[#allocation6 + $0x78] sm:$0xff]  ;;  %v2453_v8 = vld [vmem:[#allocation6 + $0x68] sm:$0xff] }
 0x1ce   :  { %2493 = vtanh.f32 %v697_v14 }
 0x1cf   :  { %v724_v20 = vpop.f32.mrf.mxu2  ;;  %2495 = vtanh.f32 %v723_v18 }
 0x1d0   :  { %v725_v23 = vadd.f32 %v724_v20, %v711_v19  ;;  %v2449_v19 = vld [vmem:[#allocation6 + $0x48] sm:$0xff]  ;;  %v2448_v20 = vld [vmem:[#allocation6 + $0x40] sm:$0xff] }
 0x1d1   :  { %v736_v29 = vpop.f32.mrf.mxu3  ;;  %v750_v30 = vpop.f32.mrf.mxu0 }
 0x1d2   :  { %2497 = vtanh.f32 %v725_v23  ;;  %v737_v37 = vadd.f32 %v736_v29, %v345_v28 }
 0x1d3   :  { %v766_v51 = vpop.f32.mrf.mxu1 }
 0x1d4   :  { %v2494_v35 = vpop.eup %2493  ;;  %v751_v46 = vadd.f32 %v750_v30, %v737_v37  ;;  %v767_v55 = vadd.f32 %v766_v51, %v346_v42  ;;  %v2463_v30 = vld [vmem:[%s2875_s6 + $0x38] sm:$0xff]  ;;  %v863_v37 = vperm.slane %v860_v15, 1  ;;  %v2464_v15 = vld [vmem:[#allocation7] sm:$0xff] }
 0x1d5   :  { %v791_v38 = vpack.c.bf16 %v2494_v35, %v2492_v33  ;;  %v2496_v41 = vpop.eup %2495 }
 0x1d6   :  { %2499 = vtanh.f32 %v751_v46 }
 0x1d7   :  { %v778_v43 = vpop.f32.mrf.mxu2  ;;  %1194 = vmatmul.bf16.vlgmr.msra.gmra.mxu3 %v791_v38 }
 0x1d8   :  { %v2498_v44 = vpop.eup %2497  ;;  %v779_v54 = vadd.f32 %v778_v43, %v765_v50  ;;  %1433 = vmatpush.bf16.msra.mxu3 %v2447_v63  ;;  %v2456_v63 = vld [vmem:[%s2875_s6] sm:$0xff] }
 0x1d9   :  { %v738_v47 = vpop.f32.mrf.mxu3  ;;  %v792_v48 = vpack.c.bf16 %v2498_v44, %v2496_v41  ;;  %v752_v52 = vpop.f32.mrf.mxu0 }
 0x1da   :  { %v739_v49 = vadd.f32 %v738_v47, %v345_v28 }
 0x1db   :  { %1208 = vmatmul.bf16.vlgmr.msrb.gmra.mxu0 %v792_v48 }
 0x1dc   :  { %v753_v53 = vadd.f32 %v752_v52, %v739_v49  ;;  %v2500_v57 = vpop.eup %2499  ;;  %1434 = vmatpush.bf16.msra.mxu3 %v2446_v0  ;;  %1447 = vmatpush.bf16.msrb.mxu0 %v2455_v4 }
 0x1de   :  { %2501 = vtanh.f32 %v753_v53 }
 0x1df   :  { %v780_v25 = vpop.f32.mrf.mxu2  ;;  %2503 = vtanh.f32 %v779_v54 }
 0x1e0   :  { %v781_v56 = vadd.f32 %v780_v25, %v767_v55  ;;  %1435 = vmatpush.bf16.msra.mxu3 %v2445_v1  ;;  %1448 = vmatpush.bf16.msrb.mxu0 %v2454_v6 }
 0x1e2   :  { %2505 = vtanh.f32 %v781_v56 }
 0x1e4   :  { %v2502_v58 = vpop.eup %2501  ;;  %1436 = vmatpush.bf16.msra.mxu3 %v2444_v2  ;;  %1449 = vmatpush.bf16.msrb.mxu0 %v2453_v8  ;;  %v1336_v2 = vld [vmem:[#allocation9 + $0x4] ss:$0 sm:$0xff] }
 0x1e5   :  { %v793_v59 = vpack.c.bf16 %v2502_v58, %v2500_v57  ;;  %v2504_v60 = vpop.eup %2503  ;;  %v2462_v57 = vld [vmem:[%s2875_s6 + $0x30] sm:$0xff]  ;;  %v2461_v58 = vld [vmem:[%s2875_s6 + $0x28] sm:$0xff] }
 0x1e7   :  { %1222 = vmatmul.bf16.vlgmr.msrb.gmra.mxu1 %v793_v59  ;;  %1250 = vmatmul.bf16.vlgmr.msrb.gmra.mxu3 %v791_v38 }
 0x1e8   :  { %v2506_v61 = vpop.eup %2505  ;;  %1437 = vmatpush.bf16.msra.mxu3 %v2443_v3  ;;  %1450 = vmatpush.bf16.msrb.mxu0 %v2452_v10 }
 0x1e9   :  { %v794_v62 = vpack.c.bf16 %v2506_v61, %v2504_v60  ;;  %1529 = vmatpush.bf16.msrb.mxu1 %v2463_v30  ;;  %v2459_v60 = vld [vmem:[%s2875_s6 + $0x18] sm:$0xff]  ;;  %v2458_v61 = vld [vmem:[%s2875_s6 + $0x10] sm:$0xff] }
 0x1eb   :  { %1236 = vmatmul.bf16.vlgmr.msrb.gmra.mxu2 %v794_v62  ;;  %1264 = vmatmul.bf16.vlgmr.msra.gmra.mxu0 %v792_v48 }
 0x1ec   :  { %1438 = vmatpush.bf16.msra.mxu3 %v2442_v5  ;;  %1451 = vmatpush.bf16.msrb.mxu0 %v2451_v12  ;;  %v2467_v12 = vld [vmem:[#allocation7 + $0x18] sm:$0xff] }
 0x1ed   :  { %1530 = vmatpush.bf16.msrb.mxu1 %v2462_v57  ;;  %1587 = vmatpush.bf16.msrb.mxu2 %v2467_v12 }
 0x1f0   :  { %1439 = vmatpush.bf16.msra.mxu3 %v2441_v7  ;;  %1452 = vmatpush.bf16.msrb.mxu0 %v2450_v16 }
 0x1f1   :  { %1531 = vmatpush.bf16.msrb.mxu1 %v2461_v58 }
 0x1f4   :  { %1440 = vmatpush.bf16.msra.mxu3 %v2440_v9  ;;  %1453 = vmatpush.bf16.msrb.mxu0 %v2449_v19 }
 0x1f7   :  { %1278 = vmatmul.bf16.vlgmr.msra.gmra.mxu1 %v793_v59  ;;  %v2460_v59 = vld [vmem:[%s2875_s6 + $0x20] sm:$0xff] }
 0x1f8   :  { %1454 = vmatpush.bf16.msrb.mxu0 %v2448_v20  ;;  %1532 = vmatpush.bf16.msrb.mxu1 %v2460_v59 }
 0x1fb   :  { %1292 = vmatmul.bf16.vlgmr.msra.gmra.mxu2 %v794_v62  ;;  %v2457_v62 = vld [vmem:[%s2875_s6 + $0x8] sm:$0xff] }
 0x1fc   :  { %1533 = vmatpush.bf16.msrb.mxu1 %v2459_v60 }
 0x200   :  { %1534 = vmatpush.bf16.msrb.mxu1 %v2458_v61 }
 0x204   :  { %1535 = vmatpush.bf16.msrb.mxu1 %v2457_v62 }
 0x208   :  { %1536 = vmatpush.bf16.msrb.mxu1 %v2456_v63 }
 0x258   :  { %v1209_v13 = vpop.f32.mrf.mxu0 }
 0x25a   :  { %v1195_v11 = vpop.f32.mrf.mxu3 }
 0x25b   :  { %v1196_v21 = vadd.f32 %v1195_v11, %v862_v17 }
 0x25d   :  { %v1210_v27 = vadd.f32 %v1209_v13, %v1196_v21  ;;  %v2466_v13 = vld [vmem:[#allocation7 + $0x10] sm:$0xff] }
 0x25e   :  { %1588 = vmatpush.bf16.msrb.mxu2 %v2466_v13 }
 0x260   :  { %v1211_v22 = vpop.f32.mrf.mxu0 }
 0x262   :  { %v1197_v18 = vpop.f32.mrf.mxu3 }
 0x263   :  { %v1198_v26 = vadd.f32 %v1197_v18, %v862_v17  ;;  %v1480_v17 = vld [vmem:[#allocation9 + $0x5] ss:$0 sm:$0xff] }
 0x264   :  { %v1223_v14 = vpop.f32.mrf.mxu1 }
 0x265   :  { %v1224_v28 = vadd.f32 %v1223_v14, %v1210_v27  ;;  %v1212_v31 = vadd.f32 %v1211_v22, %v1198_v26  ;;  %v2465_v14 = vld [vmem:[#allocation7 + $0x8] sm:$0xff] }
 0x266   :  { %1589 = vmatpush.bf16.msrb.mxu2 %v2465_v14 }
 0x268   :  { %v1265_v36 = vpop.f32.mrf.mxu0 }
 0x26a   :  { %v1251_v29 = vpop.f32.mrf.mxu3  ;;  %1590 = vmatpush.bf16.msrb.mxu2 %v2464_v15 }
 0x26b   :  { %v1252_v39 = vadd.f32 %v1251_v29, %v863_v37 }
 0x26c   :  { %v1225_v24 = vpop.f32.mrf.mxu1 }
 0x26d   :  { %v1226_v33 = vadd.f32 %v1225_v24, %v1212_v31  ;;  %v1266_v45 = vadd.f32 %v1265_v36, %v1252_v39 }
 0x26e   :  { %v1237_v23 = vpop.f32.mrf.mxu2 }
 0x26f   :  { %v1238_v32 = vadd.f32 %v1237_v23, %v1224_v28  ;;  %v1554_v23 = vld [vmem:[#allocation9 + $0x6] ss:$0 sm:$0xff] }
 0x270   :  { %v1267_v47 = vpop.f32.mrf.mxu0 }
 0x271   :  { %2507 = vtanh.f32 %v1238_v32 }
 0x272   :  { %v1253_v40 = vpop.f32.mrf.mxu3 }
 0x273   :  { %v1254_v44 = vadd.f32 %v1253_v40, %v863_v37 }
 0x274   :  { %v1279_v38 = vpop.f32.mrf.mxu1 }
 0x275   :  { %v1280_v48 = vadd.f32 %v1279_v38, %v1266_v45  ;;  %v1268_v50 = vadd.f32 %v1267_v47, %v1254_v44 }
 0x276   :  { %v1239_v34 = vpop.f32.mrf.mxu2 }
 0x277   :  { %v1240_v35 = vadd.f32 %v1239_v34, %v1226_v33  ;;  %v2508_v41 = vpop.eup %2507 }
 0x279   :  { %2509 = vtanh.f32 %v1240_v35 }
 0x27c   :  { %v1281_v49 = vpop.f32.mrf.mxu1 }
 0x27d   :  { %v1282_v52 = vadd.f32 %v1281_v49, %v1268_v50 }
 0x27e   :  { %v1293_v42 = vpop.f32.mrf.mxu2 }
 0x27f   :  { %v2510_v43 = vpop.eup %2509  ;;  %v1294_v51 = vadd.f32 %v1293_v42, %v1280_v48 }
 0x280   :  { %v1302_v46 = vpack.c.bf16 %v2510_v43, %v2508_v41 }
 0x281   :  { %2511 = vtanh.f32 %v1294_v51 }
 0x282   :  { %1441 = vmatmul.bf16.vlgmr.msra.gmra.mxu3 %v1302_v46 }
 0x286   :  { %v1295_v53 = vpop.f32.mrf.mxu2 }
 0x287   :  { %v1296_v54 = vadd.f32 %v1295_v53, %v1282_v52  ;;  %v2512_v55 = vpop.eup %2511 }
 0x289   :  { %2513 = vtanh.f32 %v1296_v54 }
 0x28f   :  { %v2514_v25 = vpop.eup %2513 }
 0x290   :  { %v1303_v56 = vpack.c.bf16 %v2514_v25, %v2512_v55 }
 0x292   :  { %1455 = vmatmul.bf16.vlgmr.msrb.gmra.mxu0 %v1303_v56 }
 0x305   :  { %v1442_v0 = vpop.f32.mrf.mxu3 }
 0x306   :  { %v1443_v3 = vadd.f32 %v1442_v0, %v1336_v2 }
 0x30d   :  { %v1444_v4 = vpop.f32.mrf.mxu3 }
 0x30e   :  { %v1445_v6 = vadd.f32 %v1444_v4, %v1336_v2 }
 0x30f   :  { %v1456_v1 = vpop.f32.mrf.mxu0 }
 0x310   :  { %v1457_v5 = vadd.f32 %v1456_v1, %v1443_v3 }
 0x312   :  { %2515 = vtanh.f32 %v1457_v5 }
 0x317   :  { %v1458_v7 = vpop.f32.mrf.mxu0 }
 0x318   :  { %v1459_v8 = vadd.f32 %v1458_v7, %v1445_v6  ;;  %v2516_v9 = vpop.eup %2515 }
 0x31a   :  { %2517 = vtanh.f32 %v1459_v8 }
 0x320   :  { %v2518_v10 = vpop.eup %2517 }
 0x321   :  { %v1463_v11 = vpack.c.bf16 %v2518_v10, %v2516_v9 }
 0x323   :  { %1537 = vmatmul.bf16.vlgmr.msrb.gmra.mxu1 %v1463_v11 }
 0x3a0   :  { %v1538_v16 = vpop.f32.mrf.mxu1 }
 0x3a1   :  { %v1539_v18 = vadd.f32 %v1538_v16, %v1480_v17 }
 0x3a3   :  { %2519 = vtanh.f32 %v1539_v18 }
 0x3a8   :  { %v1540_v19 = vpop.f32.mrf.mxu1 }
 0x3a9   :  { %v1541_v20 = vadd.f32 %v1540_v19, %v1480_v17  ;;  %v2520_v21 = vpop.eup %2519 }
 0x3ab   :  { %2521 = vtanh.f32 %v1541_v20 }
 0x3b1   :  { %v2522_v22 = vpop.eup %2521 }
 0x3b2   :  { %v1545_v24 = vpack.c.bf16 %v2522_v22, %v2520_v21 }
 0x3b4   :  { %2295 = vmatmul.msk.bf16.vlgmr.msrb.gmra.mxu2 %vm1579_vm2, %v1545_v24 }
 0x437   :  { %v1592_v26 = vpop.f32.mrf.mxu2 }
 0x438   :  { %v1593_v27 = vadd.f32 %v1592_v26, %v1554_v23 }
 0x43a   :  { %1597 = vst [vmem:[%s2878_s9] sm:$0xff] %v1593_v27 }
 0x43f   :  { %v1594_v28 = vpop.f32.mrf.mxu2 }
 0x440   :  { %v1595_v29 = vadd.f32 %v1594_v28, %v1554_v23 }
 0x442   :  { %1598 = vst [vmem:[%s2878_s9 + $0x8] sm:$0xff] %v1595_v29 }
 0x443   :  { %1603 = vsyncpa [#allocation3], 1 }
 0x444   :  { %1604 = vsyncpa [#allocation5], 1 }
 0x445   :  { %1605 = vsyncpa [#allocation8], 1 }

</bundles_post_ra>
